<compile_context>
chip_gen: v7x
topology: tpu7x:2x2x1
jax: 0.10.0
libtpu: 0.0.40
codegen_flags: <defaults>
</compile_context>

<pallas_src>
import functools

import jax
import jax.numpy as jnp
from jax.experimental import pallas as pl
from jax.experimental.pallas import tpu as pltpu


def _reeig_kernel(s_ref, u_ref, out_ref, *, epsilon):
    """Batched ReEig reconstruction: out[b] = u[b] @ diag(max(s[b], eps)) @ u[b]^T."""
    s = s_ref[...]                                  # (TB, N) f32 eigenvalues
    d = jnp.maximum(s, epsilon)                     # == f.threshold(s, eps, eps)
    u = u_ref[...]                                  # (TB, N, N) eigenvector matrices
    # u @ diag(d): scale columns.  Cast back to the operand dtype so bf16
    # inputs keep bf16 MXU operands (accumulation below stays f32).
    scaled = (u.astype(jnp.float32) * d[:, None, :]).astype(u.dtype)
    # out[b] = scaled[b] @ u[b]^T: contract the LAST axis of both operands
    # (MXU consumes the rhs pre-transposed; no explicit XLU transpose).
    out = jax.lax.dot_general(
        scaled, u,
        dimension_numbers=(((2,), (2,)), ((0,), (0,))),
        preferred_element_type=jnp.float32)
    # Lane-dense store: (TB, N, N) -> (TB, N*N) so the output block uses
    # full-128-lane unmasked stores and a dense HBM writeback.
    out_ref[...] = out.astype(out_ref.dtype).reshape(out_ref.shape)


def _pick_tile_b(B, N, itemsize, target_bytes=3 << 20):
    """Largest multiple-of-8 batch tile dividing B whose VMEM block (with lane
    padding) stays under ~target_bytes, capped at B//2 so the parallel grid
    axis has >=2 steps (lets v7x's two TensorCores split the batch).  With
    double-buffered inputs + lane-dense output this stays well inside the
    default scoped-VMEM limit on v5e (16 MiB) / v6e / v7x (32 MiB)."""
    lanes = max(N, 128)                              # minor dim pads to 128 lanes
    per_elem = (N * lanes * itemsize                 # padded (N, N) u block
                + N * N * itemsize                   # lane-dense output slab
                + lanes * 4)                         # padded eigenvalue row (f32)
    cap = max(8, (target_bytes // per_elem) // 8 * 8)
    upper = min(cap, B // 2) if B >= 16 else min(cap, B)
    best = 8
    for t in range(8, upper + 1, 8):
        if B % t == 0:
            best = t
    return best


def spd_reeig(x: jnp.ndarray, epsilon: float = 1e-4, tile_b=None) -> jnp.ndarray:
    """Forward pass of SPDReEig. x: (B, N, N) symmetric SPD matrices."""
    B, N, _ = x.shape

    # TODO(synk): batched SVD / eigendecomposition has no Pallas primitive; it
    # stays in plain JAX.  eigh (in f32) + abs matches the torch.linalg.svd
    # path of the reference module for symmetric input (singular values =
    # |eigenvalues|, left singular vectors = eigenvectors; signs cancel in
    # u @ diag @ u^T).
    w, u = jnp.linalg.eigh(x.astype(jnp.float32))
    s = jnp.abs(w)                                   # (B, N) f32
    u = u.astype(x.dtype)                            # (B, N, N)

    # Pad the batch to a multiple of 8 so a valid (8,128)-aligned tile always
    # exists; padded entries use identity eigenvectors / unit eigenvalues and
    # are sliced off below.
    Bp = ((B + 7) // 8) * 8
    if Bp != B:
        pad = Bp - B
        s = jnp.concatenate([s, jnp.ones((pad, N), jnp.float32)], axis=0)
        u = jnp.concatenate(
            [u, jnp.broadcast_to(jnp.eye(N, dtype=u.dtype), (pad, N, N))], axis=0)

    if tile_b is None:
        tile_b = _pick_tile_b(Bp, N, jnp.dtype(x.dtype).itemsize)
    assert Bp % tile_b == 0, (Bp, tile_b)
    grid = (Bp // tile_b,)

    # Epsilon is a compile-time module constant -> bake it into the kernel.
    kernel = functools.partial(_reeig_kernel, epsilon=float(epsilon))

    out_flat = pl.pallas_call(
        kernel,
        out_shape=jax.ShapeDtypeStruct((Bp, N * N), x.dtype),
        grid=grid,
        in_specs=[
            # eigenvalues: one (tile_b, N) block per step
            pl.BlockSpec((tile_b, N), lambda i: (i, 0)),
            # eigenvectors: one (tile_b, N, N) block per step
            pl.BlockSpec((tile_b, N, N), lambda i: (i, 0, 0)),
        ],
        # lane-dense output slab: last dim N*N is a multiple of 128 for N>=12
        out_specs=pl.BlockSpec((tile_b, N * N), lambda i: (i, 0)),
        compiler_params=pltpu.CompilerParams(
            dimension_semantics=("parallel",)),      # v7x: 2 TCs split the batch
    )(s, u)

    out = out_flat.reshape(Bp, N, N)
    return out[:B] if Bp != B else out


if __name__ == "__main__":
    key = jax.random.PRNGKey(0)
    B, N = 64, 16

    # Deterministic SPD inputs: A A^T / N + small ridge.
    a = jax.random.normal(key, (B, N, N), dtype=jnp.float32)
    x = a @ jnp.swapaxes(a, -1, -2) / N + 1e-3 * jnp.eye(N, dtype=jnp.float32)

    epsilon = 1e-4  # SPDReEig.__init__ default (registered buffer value)

    # Default tiling: tile_b=32 -> 2-step grid (keeps both v7x TCs busy while
    # staying far above the ~0.35 us/step pipeline overhead).
    out = jax.block_until_ready(spd_reeig(x, epsilon))

    # Pure-JAX reference of the original module's forward (svd path).
    u_ref, s_ref, _ = jnp.linalg.svd(x)
    d_ref = jnp.maximum(s_ref, epsilon)
    ref = jnp.einsum("bij,bj,bkj->bik", u_ref, d_ref, u_ref)

    assert out.shape == (B, N, N) and out.dtype == x.dtype
    max_err = float(jnp.max(jnp.abs(out - ref)))
    assert jnp.allclose(out, ref, atol=1e-3, rtol=1e-3), max_err
    print("KERNEL_OK")
</pallas_src>

<mosaic_0001>
module attributes {stable_mosaic.version = 11 : i64} {
  func.func @_reeig_kernel(%arg0: i32, %arg1: memref<32x16xf32, #tpu.memory_space<vmem>>, %arg2: memref<32x16x16xf32, #tpu.memory_space<vmem>>, %arg3: memref<32x256xf32, #tpu.memory_space<vmem>>) attributes {dimension_semantics = [#tpu.dimension_semantics<parallel>], iteration_bounds = array<i64: 2>, scalar_prefetch = 0 : i64, scratch_operands = 0 : i64, tpu.core_type = #tpu.core_type<tc>, window_params = [{transform_indices = @transform_0, window_bounds = array<i64: 32, 16>}, {transform_indices = @transform_1, window_bounds = array<i64: 32, 16, 16>}, {transform_indices = @transform_2, window_bounds = array<i64: 32, 256>}]} {
    %c0 = arith.constant 0 : index
    %c0_0 = arith.constant 0 : index
    %0 = vector.load %arg1[%c0, %c0_0] : memref<32x16xf32, #tpu.memory_space<vmem>>, vector<32x16xf32>
    %cst = arith.constant 9.99999974E-5 : f32
    %1 = vector.broadcast %cst : f32 to vector<32x16xf32>
    %2 = arith.maximumf %0, %1 : vector<32x16xf32>
    %c0_1 = arith.constant 0 : index
    %c0_2 = arith.constant 0 : index
    %c0_3 = arith.constant 0 : index
    %3 = vector.load %arg2[%c0_1, %c0_2, %c0_3] : memref<32x16x16xf32, #tpu.memory_space<vmem>>, vector<32x16x16xf32>
    %4 = vector.shape_cast %2 : vector<32x16xf32> to vector<32x1x16xf32>
    %5 = vector.broadcast %4 : vector<32x1x16xf32> to vector<32x16x16xf32>
    %6 = arith.mulf %3, %5 : vector<32x16x16xf32>
    %cst_4 = arith.constant dense<0.000000e+00> : vector<32x16x16xf32>
    %7 = tpu.matmul %6, %3, %cst_4 {dimension_numbers = #tpu.dot_dimension_numbers<[2], [2], [1], [1], [0, 0, 0, 1, 1, 1], [0], [0]>} : vector<32x16x16xf32>, vector<32x16x16xf32>, vector<32x16x16xf32> -> vector<32x16x16xf32>
    %8 = vector.shape_cast %7 : vector<32x16x16xf32> to vector<32x256xf32>
    %c0_5 = arith.constant 0 : index
    %c0_6 = arith.constant 0 : index
    %9 = vector.load %arg3[%c0_5, %c0_6] : memref<32x256xf32, #tpu.memory_space<vmem>>, vector<32x256xf32>
    tpu.vector_store %arg3[%c0_5, %c0_6], %8 {strides = array<i32>} : memref<32x256xf32, #tpu.memory_space<vmem>>, vector<32x256xf32>,
    return
  }
  func.func @transform_0(%arg0: i32) -> (i32, i32) {
    %c0_i32 = arith.constant 0 : i32
    %c0_i32_0 = arith.constant 0 : i32
    return %arg0, %c0_i32 : i32, i32
  }
  func.func @transform_1(%arg0: i32) -> (i32, i32, i32) {
    %c0_i32 = arith.constant 0 : i32
    %c0_i32_0 = arith.constant 0 : i32
    %c0_i32_1 = arith.constant 0 : i32
    return %arg0, %c0_i32, %c0_i32_0 : i32, i32, i32
  }
  func.func @transform_2(%arg0: i32) -> (i32, i32) {
    %c0_i32 = arith.constant 0 : i32
    %c0_i32_0 = arith.constant 0 : i32
    return %arg0, %c0_i32 : i32, i32
  }
}

</mosaic_0001>

<bundles_post_ra>
// kernel: tpu_custom_call.1
= control target key start
LH: loop header
LB: loop body
LE: loop exit
PB: predicated region body
PF: predicated region fallthrough
CT: control target
= control target key end

     0   :  { %7 = vsyncpa [#allocation3], 0  ;;  %s6993_s0 = inlined_call_operand.vmem [shape: f32[64,16], index: 0, kind: input, shape index: {}]   ;;  %s6994_s1 = inlined_call_operand.vmem [shape: f32[64,16,16], index: 1, kind: input, shape index: {}]   ;;  %s6995_s2 = inlined_call_operand.hbm [shape: f32[64,256], index: 2, kind: output, shape index: {}]  }
   0x1   :  { %9 = vsyncpa [#allocation3 + $0x1], 0  ;;  %s5754_s9 = smov 0   ;;  %s5756_s10 = smov 0  }
   0x2   :  { %s5758_s11 = smov 0   ;;  %s5760_s12 = smov 0  }
   0x3 LB: > { %s5775_s13 = sadd.s32 4294967295, %s5725_s12   ;;  %s4922_s14 = sadd.s32 4294967294, %s5725_s12   ;;  %s5725_s12 = sphi %s5760_s12, %s7046_s12   ;;  %s5721_s11 = sphi %s5758_s11, %s7045_s11   ;;  %s5717_s10 = sphi %s5756_s10, %s7044_s10   ;;  %s5713_s9 = sphi %s5754_s9, %s7043_s9  }
   0x4   : > { %s5779_s15 = sadd.s32 1, %s5725_s12   ;;  %s74_s16 = sadd.s32 1, %s5721_s11 }
   0x5   : > { %s71_s17 = ssub.s32 %s5725_s12, %s5779_s15  ;;  %p84_p0 = scmp.ne.s32.totalorder %s5721_s11, %s5717_s10 }
   0x6   : > { %p72_p1 = scmp.eq.s32.totalorder %s71_s17, 0  ;;  %p85_p2 = scmp.eq.s32.totalorder %s5775_s13, 1 }
   0x7   : > { %p90_p3 = scmp.ne.s32.totalorder %s5717_s10, %s5713_s9  ;;  %p91_p4 = scmp.eq.s32.totalorder %s4922_s14, 1 }
   0x8   : > { %s5790_s18 = scalar_select %p72_p1, %s5721_s11, %s74_s16  }
   0x9   : > { %p5792_p5 = por %p85_p2, %p84_p0  ;;  %p5796_p6 = por %p91_p4, %p90_p3 }
   0xa   : > { %p4925_p7 = scmp.ge.s32.totalorder %s5725_s12, 1  ;;  %p128_p8 = scmp.lt.s32.totalorder %s5725_s12, 3 }
   0xc   : > { %p129_p9 = pnand %p4925_p7, %p128_p8 }
   0xe   : > { %132 = sbr.rel (%p129_p9) target bundleno = 546 (0x222), region = 28 }
  0x15   : > { %s4927_s21 = sshll.u32 %s5775_s13, 2  ;;  %s4929_s22 = sshll.u32 %s5775_s13, 5  ;;  %v250_v0 = vlaneseq  ;;  %v5727_v1 = vmov 1966171168   ;;  %vm666_vm0 = vcmask 130048   ;;  %vm4767_vm2 = vcmask 261120  }
  0x16   : > { %p157_p10 = scmp.lt.s32.totalorder %s4927_s21, 7  ;;  %p163_p11 = scmp.lt.s32.totalorder %s4929_s22, 63  ;;  %v248_v2 = vunpack.c.l.s4 %v5727_v1  ;;  %vm5822_vm1 = vmpackc.low %vm666_vm0, %vm666_vm0  ;;  %vm4772_vm3 = vcmask 392192   ;;  %vm4777_vm4 = vcmask 523264   ;;  %vm4782_vm5 = vcmask 654336  }
  0x17   : > { %v5804_v3 = vshrl.u32 %v250_v0, 7  ;;  %s5730_s3 = smov 96   ;;  %s5731_s4 = smov 16   ;;  %vm4787_vm6 = vcmask 785408   ;;  %vm4792_vm7 = vcmask 916480  }
  0x18   : > { %s7048_s21 = smov (!%p157_p10, %s4927_s21), 7  ;;  %v249_v4 = vunpack.c.0.s8 %v248_v2  ;;  %s7050_s22 = smov (!%p163_p11, %s4929_s22), 63 }
  0x19   : > { %7003 = vst [vmem:[#allocation5_spill] sm:$0xff] %v5804_v3  ;;  %s4928_s23 = sshll.u32 %s7048_s21, 3  ;;  %s5066_s27 = sshll.u32 %s7050_s22, 4  ;;  %v5830_v12 = vsub.s32 0, %v5804_v3 }
  0x1a   : > { %s5809_s26 = scalar_lea.vmem %s6993_s0, %s4928_s23  ;;  %v5812_v5 = vsub.s32 %v249_v4, %v5804_v3  ;;  %s5817_s30 = scalar_lea.vmem %s6994_s1, %s5066_s27 }
  0x1b   : > { %v170_v6 = vld [vmem:[%s5809_s26] sm:$0xff]  ;;  %v179_v10 = vld [vmem:[%s5817_s30 + $0x8] sm:$0xff]  ;;  %v180_v11 = vld [vmem:[%s5817_s30 + $0x10] sm:$0xff]  ;;  %s5732_s5 = smov 112   ;;  %s5733_s6 = smov 32  }
  0x1c   : > { %v174_v8 = vmax.f32 %v170_v6, 0.0001  ;;  %v178_v9 = vld [vmem:[%s5817_s30] sm:$0xff]  ;;  %v181_v14 = vld [vmem:[%s5817_s30 + $0x18] sm:$0xff]  ;;  %v183_v16 = vld [vmem:[%s5817_s30 + $0x28] sm:$0xff]  ;;  %s5734_s7 = smov 48  }
  0x1d   : > { %v5421_v13 = vpack.c.bf16 %v179_v10, %v178_v9  ;;  %v182_v15 = vld [vmem:[%s5817_s30 + $0x20] sm:$0xff]  ;;  %v5427_v19 = vpack.c.bf16 %v181_v14, %v180_v11  ;;  %v184_v21 = vld [vmem:[%s5817_s30 + $0x30] sm:$0xff]  ;;  %v185_v22 = vld [vmem:[%s5817_s30 + $0x38] sm:$0xff]  ;;  %s5735_s8 = smov 64   ;;  %s5736_s14 = smov 80  }
  0x1e   : > { %v246_v17 = vcombine.high %v174_v8, %v174_v8  ;;  %v253_v18 = vrot.slane %v174_v8, %v5812_v5  ;;  %v5433_v20 = vpack.c.bf16 %v183_v16, %v182_v15  ;;  %v5439_v23 = vpack.c.bf16 %v185_v22, %v184_v21  ;;  %v186_v30 = vld [vmem:[%s5817_s30 + $0x40] sm:$0xff]  ;;  %v187_v31 = vld [vmem:[%s5817_s30 + $0x48] sm:$0xff]  ;;  %v188_v39 = vld [vmem:[%s5817_s30 + $0x50] sm:$0xff]  ;;  %s153_s16 = sand.u32 1, %s5717_s10   ;;  %s5068_s22 = sshll.u32 %s5775_s13, 10 }
  0x1f   : > { %5423 = vmatprep.subr.msk.bf16.mxu0 %vm5822_vm1, %v5421_v13  ;;  %5429 = vmatprep.subr.msk.bf16.mxu1 %vm5822_vm1, %v5427_v19  ;;  %v171_v32 = vld [vmem:[%s5809_s26 + $0x8] sm:$0xff]  ;;  %v189_v40 = vld [vmem:[%s5817_s30 + $0x58] sm:$0xff]  ;;  %v5445_v42 = vpack.c.bf16 %v187_v31, %v186_v30  ;;  %v190_v54 = vld [vmem:[%s5817_s30 + $0x60] sm:$0xff]  ;;  %s4926_s17 = sshll.u32 %s153_s16, 6  ;;  %s6951_s13 = scalar_lea.sflag [#allocation3], %s153_s16 }
  0x20   : > { %v269_v24 = vrot.slane %v253_v18, %v5812_v5  ;;  %5426 = vmatpush3.bf16.xpose.msk.msra.mxu0 %vm5822_vm1, %v5421_v13  ;;  %v261_v25 = vcombine.high %v253_v18, %v253_v18  ;;  %v260_v26 = vrot.slane %v246_v17, %v5812_v5  ;;  %5432 = vmatpush3.bf16.xpose.msk.msra.mxu1 %vm5822_vm1, %v5427_v19  ;;  %v5862_v43 = vmax.f32 %v171_v32, 0.0001  ;;  %v191_v55 = vld [vmem:[%s5817_s30 + $0x68] sm:$0xff]  ;;  %v192_v59 = vld [vmem:[%s5817_s30 + $0x70] sm:$0xff]  ;;  %v193_v60 = vld [vmem:[%s5817_s30 + $0x78] sm:$0xff]  ;;  %s6860_s21 = scalar_lea.vmem [#allocation2], %s4926_s17 }
  0x21   : > { %5435 = vmatprep.subr.msk.bf16.mxu0 %vm5822_vm1, %v5433_v20  ;;  %5441 = vmatprep.subr.msk.bf16.mxu1 %vm5822_vm1, %v5439_v23  ;;  %v5451_v49 = vpack.c.bf16 %v189_v40, %v188_v39  ;;  %v5457_v62 = vpack.c.bf16 %v191_v55, %v190_v54  ;;  %v172_v2 = vld [vmem:[%s5809_s26 + $0x10] sm:$0xff]  ;;  %v5463_v4 = vpack.c.bf16 %v193_v60, %v192_v59  ;;  %v194_v8 = vld [vmem:[%s5817_s30 + $0x80] sm:$0xff]  ;;  %v5909_v17 = vld [vmem:[%s5817_s30 + $0x98] sm:$0xff]  ;;  %s4848_s23 = sshll.u32 %s6860_s21, 4  ;;  %s5737_s28 = smov [#allocation2]   ;;  %s6945_s23 = int_to_ptr.vmem [resolvable:$true] %s4848_s23 }
  0x22   : > { %v291_v27 = vcombine.high %v269_v24, %v269_v24  ;;  %v445_v28 = vrot.slane %v269_v24, %v5830_v12  ;;  %v283_v29 = vrot.slane %v261_v25, %v5812_v5  ;;  %v276_v33 = vrot.slane %v260_v26, %v5812_v5  ;;  %v5920_v24 = vld [vmem:[%s5817_s30 + $0xb0] sm:$0xff]  ;;  %s5663_s27 = scalar_lea.vmem %s6945_s23, 1024  ;;  %s5667_s29 = sshll.u32 %s5737_s28, 4  ;;  %s5668_s29 = int_to_ptr.vmem [resolvable:$false] %s5667_s29 }
  0x23   : > { %v262_v34 = vcombine.high %v260_v26, %v260_v26  ;;  %v302_v52 = vrot.slane %v5862_v43, %v5812_v5  ;;  %v176_v13 = vmax.f32 %v172_v2, 0.0001  ;;  %v295_v18 = vcombine.high %v5862_v43, %v5862_v43  ;;  %v173_v43 = vld [vmem:[%s5809_s26 + $0x18] sm:$0xff]  ;;  %s6942_s26 = scalar_lea.hbm %s6995_s2, %s5068_s22  ;;  %p5664_p12 = scmp.ne.s32.totalorder %s6945_s23, %s5663_s27 }
  0x24   : > { %v603_v35 = vmul.f32 %v445_v28, %v179_v10  ;;  %v293_v36 = vcombine.high %v283_v29, %v283_v29  ;;  %v449_v37 = vrot.slane %v283_v29, %v5830_v12  ;;  %v602_v38 = vmul.f32 %v445_v28, %v178_v9  ;;  %v195_v9 = vld [vmem:[%s5817_s30 + $0x88] sm:$0xff]  ;;  %v5926_v28 = vld [vmem:[%s5817_s30 + $0xb8] sm:$0xff]  ;;  %v5929_v29 = vld [vmem:[%s5817_s30 + $0xc0] sm:$0xff]  ;;  %p5670_p1 = scmp.lt.s32.totalorder %s6945_s23, %s5668_s29 }
  0x25   : > { %v453_v41 = vrot.slane %v291_v27, %v5830_v12  ;;  %v290_v47 = vrot.slane %v262_v34, %v5812_v5  ;;  %v461_v50 = vrot.slane %v276_v33, %v5830_v12  ;;  %v292_v58 = vcombine.high %v276_v33, %v276_v33  ;;  %p5665_p13 = pnand %p5664_p12, %p5792_p5 }
  0x26   : > { %v605_v44 = vmul.f32 %v449_v37, %v181_v14  ;;  %5201 = vmatprep.mubr.msk.f32.mxu0 %vm666_vm0, %v602_v38  ;;  %v604_v45 = vmul.f32 %v449_v37, %v180_v11  ;;  %v457_v46 = vrot.slane %v293_v36, %v5830_v12  ;;  %v318_v63 = vrot.slane %v302_v52, %v5812_v5 }
  0x27   : > { %5202 = vmatmul.mubr.msk.f32.vlgmr.msra.gmra.mrb[0].mxu0 %vm666_vm0, %v603_v35  ;;  %v606_v48 = vmul.f32 %v453_v41, %v182_v15  ;;  %v465_v53 = vrot.slane %v290_v47, %v5830_v12  ;;  %v607_v56 = vmul.f32 %v453_v41, %v183_v16  ;;  %v610_v57 = vmul.f32 %v461_v50, %v186_v30  ;;  %v196_v16 = vld [vmem:[%s5817_s30 + $0x90] sm:$0xff]  ;;  %v5932_v30 = vld [vmem:[%s5817_s30 + $0xc8] sm:$0xff]  ;;  %p5666_p0 = pneg %p5665_p13 }
  0x28   : > { %5438 = vmatpush3.bf16.xpose.msk.msra.mxu0 %vm5822_vm1, %v5433_v20  ;;  %5208 = vmatprep.mubr.msk.f32.mxu1 %vm666_vm0, %v604_v45  ;;  %v608_v51 = vmul.f32 %v457_v46, %v184_v21  ;;  %v609_v61 = vmul.f32 %v457_v46, %v185_v22  ;;  %v294_v1 = vcombine.high %v290_v47, %v290_v47  ;;  %v198_v22 = vld [vmem:[%s5817_s30 + $0xa0] sm:$0xff] }
  0x29   : > { %5209 = vmatmul.mubr.msk.f32.vlgmr.msra.gmra.mrb[0].mxu1 %vm666_vm0, %v605_v44  ;;  %5215 = vmatprep.mubr.msk.f32.mxu0 %vm666_vm0, %v606_v48  ;;  %v612_v0 = vmul.f32 %v465_v53, %v188_v39  ;;  %v469_v6 = vrot.slane %v292_v58, %v5830_v12  ;;  %v477_v10 = vrot.slane %v318_v63, %v5830_v12  ;;  %v5974_v48 = vld [vmem:[%s5817_s30 + $0xd0] sm:$0xff]  ;;  %v5996_v58 = vld [vmem:[%s5817_s30 + $0x128] sm:$0xff] }
  0x2a   : > { %5444 = vmatpush3.bf16.xpose.msk.msra.mxu1 %vm5822_vm1, %v5439_v23  ;;  %5447 = vmatprep.subr.msk.bf16.mxu0 %vm5822_vm1, %v5445_v42  ;;  %v310_v11 = vcombine.high %v302_v52, %v302_v52  ;;  %v473_v14 = vrot.slane %v294_v1, %v5830_v12  ;;  %v611_v15 = vmul.f32 %v461_v50, %v187_v31  ;;  %v5917_v23 = vld [vmem:[%s5817_s30 + $0xa8] sm:$0xff] }
  0x2b   : > { %5222 = vmatprep.mubr.msk.f32.mxu1 %vm666_vm0, %v608_v51  ;;  %5453 = vmatprep.subr.msk.bf16.mxu1 %vm5822_vm1, %v5451_v49  ;;  %v613_v19 = vmul.f32 %v465_v53, %v189_v40  ;;  %v614_v20 = vmul.f32 %v469_v6, %v190_v54  ;;  %v5913_v21 = vpack.c.bf16 %v195_v9, %v194_v8 }
  0x2c   : > { %v615_v25 = vmul.f32 %v469_v6, %v191_v55  ;;  %v5922_v26 = vmul.f32 %v477_v10, %v195_v9  ;;  %v332_v27 = vrot.slane %v310_v11, %v5812_v5  ;;  %v351_v31 = vrot.slane %v176_v13, %v5812_v5 }
  0x2d   : > { %v616_v32 = vmul.f32 %v473_v14, %v192_v59  ;;  %v5936_v33 = vpack.c.bf16 %v5909_v17, %v196_v16  ;;  %v618_v34 = vmul.f32 %v477_v10, %v194_v8  ;;  %v340_v35 = vcombine.high %v318_v63, %v318_v63 }
  0x2e   : > { %v5940_v36 = vpack.c.bf16 %v5917_v23, %v198_v22  ;;  %v309_v37 = vrot.slane %v295_v18, %v5812_v5  ;;  %v5944_v38 = vrot.slane %v351_v31, %v5812_v5  ;;  %v359_v39 = vcombine.high %v351_v31, %v351_v31 }
  0x2f   : > { %5216 = vmatmul.mubr.msk.f32.vlgmr.msra.gmra.mrb[2].mxu0 %vm666_vm0, %v607_v56  ;;  %v5951_v40 = vpack.c.bf16 %v5926_v28, %v5920_v24  ;;  %v5955_v41 = vpack.c.bf16 %v5932_v30, %v5929_v29  ;;  %v617_v44 = vmul.f32 %v473_v14, %v193_v60  ;;  %v5963_v45 = vrot.slane %v332_v27, %v5830_v12  ;;  %v6027_v14 = vld [vmem:[%s5817_s30 + $0x138] sm:$0xff] }
  0x30   : > { %5450 = vmatpush3.bf16.xpose.msk.msra.mxu0 %vm5822_vm1, %v5445_v42  ;;  %5229 = vmatprep.mubr.msk.f32.mxu0 %vm666_vm0, %v610_v57  ;;  %v344_v42 = vcombine.high %v176_v13, %v176_v13  ;;  %v389_v46 = vcombine.high %v5944_v38, %v5944_v38  ;;  %v5971_v47 = vrot.slane %v340_v35, %v5830_v12  ;;  %v5987_v55 = vmax.f32 %v173_v43, 0.0001  ;;  %v5993_v57 = vld [vmem:[%s5817_s30 + $0x120] sm:$0xff]  ;;  %v6024_v13 = vld [vmem:[%s5817_s30 + $0x130] sm:$0xff]  ;;  %v6073_v35 = vld [vmem:[%s5817_s30 + $0x168] sm:$0xff] }
  0x31   : > { %5223 = vmatmul.mubr.msk.f32.vlgmr.msra.gmra.mrb[2].mxu1 %vm666_vm0, %v609_v61  ;;  %5459 = vmatprep.subr.msk.bf16.mxu0 %vm5822_vm1, %v5457_v62  ;;  %v5980_v50 = vrot.slane %v359_v39, %v5812_v5  ;;  %v342_v52 = vcombine.high %v332_v27, %v332_v27  ;;  %v311_v53 = vcombine.high %v309_v37, %v309_v37 }
  0x32   : > { %5456 = vmatpush3.bf16.xpose.msk.msra.mxu1 %vm5822_vm1, %v5451_v49  ;;  %5236 = vmatprep.mubr.msk.f32.mxu1 %vm666_vm0, %v612_v0  ;;  %v5977_v49 = vld [vmem:[%s5817_s30 + $0xd8] sm:$0xff]  ;;  %v358_v51 = vrot.slane %v344_v42, %v5812_v5  ;;  %v517_v54 = vrot.slane %v389_v46, %v5830_v12  ;;  %v5990_v56 = vrot.slane %v309_v37, %v5812_v5 }
  0x33   : > { %5465 = vmatprep.subr.msk.bf16.mxu1 %vm5822_vm1, %v5463_v4  ;;  %v391_v59 = vcombine.high %v5980_v50, %v5980_v50  ;;  %v6004_v63 = vpack.c.bf16 %v5977_v49, %v5974_v48  ;;  %v6017_v9 = vrot.slane %v342_v52, %v5830_v12  ;;  %v622_v10 = vmul.f32 %v5971_v47, %v198_v22 }
  0x34   : > { %v374_v60 = vrot.slane %v358_v51, %v5812_v5  ;;  %v360_v61 = vcombine.high %v358_v51, %v358_v51  ;;  %v6007_v0 = vmul.f32 %v517_v54, %v5996_v58  ;;  %v6010_v1 = vmul.f32 %v517_v54, %v5993_v57 }
  0x35   : > { %v521_v2 = vrot.slane %v391_v59, %v5830_v12  ;;  %v6021_v11 = vrot.slane %v311_v53, %v5812_v5  ;;  %v621_v59 = vmul.f32 %v5963_v45, %v5909_v17  ;;  %v6117_v17 = vld [vmem:[%s5817_s30 + $0x180] sm:$0xff] }
  0x36   : > { %v388_v6 = vrot.slane %v360_v61, %v5812_v5  ;;  %v390_v8 = vcombine.high %v374_v60, %v374_v60  ;;  %v624_v61 = vmul.f32 %v6017_v9, %v5920_v24 }
  0x37   : > { %5230 = vmatmul.mubr.msk.f32.vlgmr.msra.gmra.mrb[4].mxu0 %vm666_vm0, %v611_v15  ;;  %v6030_v15 = vld [vmem:[%s5817_s30 + $0x148] sm:$0xff]  ;;  %v6039_v18 = vmul.f32 %v521_v2, %v6027_v14  ;;  %v6048_v22 = vmul.f32 %v521_v2, %v6024_v13  ;;  %v6106_v2 = vld [vmem:[%s5817_s30 + $0x178] sm:$0xff] }
  0x38   : > { %5462 = vmatpush3.bf16.xpose.msk.msra.mxu0 %vm5822_vm1, %v5457_v62  ;;  %5243 = vmatprep.mubr.msk.f32.mxu0 %vm666_vm0, %v614_v20  ;;  %v620_v62 = vmul.f32 %v5963_v45, %v196_v16  ;;  %v400_v16 = vrot.slane %v5987_v55, %v5812_v5  ;;  %v533_v31 = vrot.slane %v390_v8, %v5830_v12 }
  0x39   : > { %5237 = vmatmul.mubr.msk.f32.vlgmr.msra.gmra.mrb[4].mxu1 %vm666_vm0, %v613_v19  ;;  %5471 = vmatprep.subr.msk.bf16.mxu0 %vm5822_vm1, %v5913_v21  ;;  %v6042_v19 = vld [vmem:[%s5817_s30 + $0x140] sm:$0xff]  ;;  %v392_v37 = vcombine.high %v388_v6, %v388_v6 }
  0x3a   : > { %5468 = vmatpush3.bf16.xpose.msk.msra.mxu1 %vm5822_vm1, %v5463_v4  ;;  %5250 = vmatprep.mubr.msk.f32.mxu1 %vm666_vm0, %v616_v32  ;;  %v525_v4 = vrot.slane %v374_v60, %v5830_v12  ;;  %v6067_v32 = vld [vmem:[%s5817_s30 + $0x158] sm:$0xff]  ;;  %v416_v39 = vrot.slane %v400_v16, %v5812_v5  ;;  %v408_v42 = vcombine.high %v400_v16, %v400_v16 }
  0x3b   : > { %5477 = vmatprep.subr.msk.bf16.mxu1 %vm5822_vm1, %v5936_v33  ;;  %v6083_v43 = vmul.f32 %v533_v31, %v6073_v35  ;;  %v537_v51 = vrot.slane %v392_v37, %v5830_v12  ;;  %v6098_v60 = vrot.slane %v5990_v56, %v5830_v12 }
  0x3c   : > { %v6045_v20 = vmul.f32 %v525_v4, %v6030_v15  ;;  %v6059_v27 = vmul.f32 %v525_v4, %v6042_v19  ;;  %v541_v52 = vrot.slane %v416_v39, %v5830_v12  ;;  %v430_v53 = vrot.slane %v408_v42, %v5812_v5  ;;  %v6109_v4 = vld [vmem:[%s5817_s30 + $0x188] sm:$0xff] }
  0x3d   : > { %v438_v54 = vcombine.high %v416_v39, %v416_v39  ;;  %v6114_v8 = vmul.f32 %v537_v51, %v6106_v2 }
  0x3e   : > { %v6120_v45 = vmul.f32 %v541_v52, %v6109_v4  ;;  %v545_v16 = vrot.slane %v430_v53, %v5830_v12  ;;  %v440_v39 = vcombine.high %v430_v53, %v430_v53  ;;  %v6154_v53 = vld [vmem:[%s5817_s30 + $0x1a8] sm:$0xff] }
  0x3f   : > { %5244 = vmatmul.mubr.msk.f32.vlgmr.msra.gmra.mrb[6].mxu0 %vm666_vm0, %v615_v25  ;;  %v529_v25 = vrot.slane %v388_v6, %v5830_v12  ;;  %v393_v6 = vcombine.high %v5987_v55, %v5987_v55  ;;  %7006 = vst [vmem:[#allocation6_spill] sm:$0xff] %v6114_v8  ;;  %v6129_v55 = vld [vmem:[%s5817_s30 + $0x190] sm:$0xff]  ;;  %v549_v37 = vrot.slane %v438_v54, %v5830_v12 }
  0x40   : > { %5474 = vmatpush3.bf16.xpose.msk.msra.mxu0 %vm5822_vm1, %v5913_v21  ;;  %5257 = vmatprep.mubr.msk.f32.mxu0 %vm666_vm0, %v618_v34  ;;  %v6055_v21 = vld [vmem:[%s5817_s30 + $0x150] sm:$0xff]  ;;  %v6070_v34 = vld [vmem:[%s5817_s30 + $0x160] sm:$0xff]  ;;  %7007 = vst [vmem:[#allocation7_spill] sm:$0xff] %v6120_v45  ;;  %v6157_v54 = vmul.f32 %v545_v16, %v6129_v55 }
  0x41   : > { %5251 = vmatmul.mubr.msk.f32.vlgmr.msra.gmra.mrb[6].mxu1 %vm666_vm0, %v617_v44  ;;  %5483 = vmatprep.subr.msk.bf16.mxu0 %vm5822_vm1, %v5940_v36  ;;  %v6086_v44 = vmul.f32 %v529_v25, %v6055_v21  ;;  %v6089_v46 = vmul.f32 %v533_v31, %v6070_v34  ;;  %v6135_v31 = vmul.f32 %v541_v52, %v6117_v17  ;;  %v6151_v52 = vld [vmem:[%s5817_s30 + $0x1a0] sm:$0xff] }
  0x42   : > { %5480 = vmatpush3.bf16.xpose.msk.msra.mxu1 %vm5822_vm1, %v5936_v33  ;;  %5264 = vmatprep.mubr.msk.f32.mxu1 %vm666_vm0, %v620_v62  ;;  %v6080_v33 = vmul.f32 %v529_v25, %v6067_v32  ;;  %v6103_v62 = vld [vmem:[%s5817_s30 + $0x170] sm:$0xff]  ;;  %v6132_v25 = vld [vmem:[%s5817_s30 + $0x198] sm:$0xff]  ;;  %v407_v42 = vrot.slane %v393_v6, %v5812_v5  ;;  %7010 = vst [vmem:[#allocation10_spill] sm:$0xff] %v6157_v54 }
  0x43   : > { %5489 = vmatprep.subr.msk.bf16.mxu1 %vm5822_vm1, %v5951_v40  ;;  %v6123_v24 = vmul.f32 %v537_v51, %v6103_v62  ;;  %7008 = vst [vmem:[#allocation8_spill] sm:$0xff] %v6135_v31  ;;  %v6148_v51 = vmul.f32 %v545_v16, %v6132_v25  ;;  %v553_v6 = vrot.slane %v440_v39, %v5830_v12  ;;  %v6179_v16 = vld [vmem:[%s5817_s30 + $0x1b0] sm:$0xff]  ;;  %v209_v54 = vld [vmem:[%s5817_s30 + $0xf8] sm:$0xff]  ;;  %v6215_v31 = vld [vmem:[%s5817_s30 + $0x1c8] sm:$0xff] }
  0x44   : > { %v6169_v3 = vmul.f32 %v549_v37, %v6151_v52  ;;  %7013 = vst [vmem:[#allocation13_spill] sm:$0xff] %v6179_v16  ;;  %v409_v45 = vcombine.high %v407_v42, %v407_v42 }
  0x45   : > { %7009 = vst [vmem:[#allocation9_spill] sm:$0xff] %v6148_v51  ;;  %v6182_v51 = vld [vmem:[%s5817_s30 + $0x1b8] sm:$0xff]  ;;  %v6196_v39 = vmul.f32 %v553_v6, %v6179_v16  ;;  %v6234_v16 = vld [vmem:[%s5817_s30 + $0x1e8] sm:$0xff] }
  0x46   : > { %7012 = vst [vmem:[#allocation12_spill] sm:$0xff] %v6169_v3  ;;  %7014 = vst [vmem:[#allocation14_spill] sm:$0xff] %v6182_v51  ;;  %v208_v3 = vld [vmem:[%s5817_s30 + $0xf0] sm:$0xff] }
  0x47   : > { %5258 = vmatmul.mubr.msk.f32.vlgmr.msra.gmra.mrb[8].mxu0 %vm666_vm0, %v5922_v26  ;;  %v6145_v26 = vrot.slane %v6021_v11, %v5830_v12  ;;  %7016 = vst [vmem:[#allocation16_spill] sm:$0xff] %v6196_v39  ;;  %v6212_v39 = vld [vmem:[%s5817_s30 + $0x1c0] sm:$0xff]  ;;  %7019 = vst [vmem:[#allocation19_spill] sm:$0xff] %v6234_v16 }
  0x48   : > { %5486 = vmatpush3.bf16.xpose.msk.msra.mxu0 %vm5822_vm1, %v5940_v36  ;;  %5271 = vmatprep.mubr.msk.f32.mxu0 %vm666_vm0, %v622_v10  ;;  %v206_v36 = vld [vmem:[%s5817_s30 + $0xe0] sm:$0xff]  ;;  %v6165_v10 = vmul.f32 %v549_v37, %v6154_v53  ;;  %v623_v37 = vmul.f32 %v5971_v47, %v5917_v23  ;;  %v437_v47 = vrot.slane %v409_v45, %v5812_v5 }
  0x49   : > { %5265 = vmatmul.mubr.msk.f32.vlgmr.msra.gmra.mrb[8].mxu1 %vm666_vm0, %v621_v59  ;;  %5495 = vmatprep.subr.msk.bf16.mxu0 %vm5822_vm1, %v5955_v41  ;;  %v6176_v59 = vld [vmem:[%s5817_s30 + $0xe8] sm:$0xff] }
  0x4a   : > { %7011 = vst [vmem:[#allocation11_spill] sm:$0xff] %v6165_v10  ;;  %5492 = vmatpush3.bf16.xpose.msk.msra.mxu1 %vm5822_vm1, %v5951_v40  ;;  %5278 = vmatprep.mubr.msk.f32.mxu1 %vm666_vm0, %v624_v61  ;;  %v423_v10 = vrot.slane %v407_v42, %v5812_v5  ;;  %v341_v40 = vcombine.high %v5990_v56, %v5990_v56 }
  0x4b   : > { %5501 = vmatprep.subr.msk.bf16.mxu1 %vm5822_vm1, %v6004_v63  ;;  %v6193_v61 = vmul.f32 %v553_v6, %v6182_v51  ;;  %v626_v42 = vmul.f32 %v6098_v60, %v5929_v29  ;;  %v625_v56 = vmul.f32 %v6017_v9, %v5926_v28  ;;  %v628_v6 = vmul.f32 %v6145_v26, %v5974_v48  ;;  %v6231_v51 = vld [vmem:[%s5817_s30 + $0x1d8] sm:$0xff] }
  0x4c   : > { %v557_v23 = vrot.slane %v423_v10, %v5830_v12  ;;  %v439_v8 = vcombine.high %v423_v10, %v423_v10  ;;  %v343_v29 = vcombine.high %v6021_v11, %v6021_v11  ;;  %v561_v45 = vrot.slane %v437_v47, %v5830_v12  ;;  %v6228_v10 = vld [vmem:[%s5817_s30 + $0x1d0] sm:$0xff] }
  0x4d   : > { %7015 = vst [vmem:[#allocation15_spill] sm:$0xff] %v6193_v61  ;;  %v5505_v61 = vpack.c.bf16 %v6176_v59, %v206_v36  ;;  %v501_v48 = vrot.slane %v341_v40, %v5830_v12  ;;  %v5511_v11 = vpack.c.bf16 %v209_v54, %v208_v3 }
  0x4e   : > { %v6218_v5 = vmul.f32 %v557_v23, %v6215_v31  ;;  %v6222_v28 = vmul.f32 %v557_v23, %v6212_v39  ;;  %v565_v9 = vrot.slane %v439_v8, %v5830_v12  ;;  %v6241_v8 = vmul.f32 %v561_v45, %v6231_v51 }
  0x4f   : > { %5272 = vmatmul.mubr.msk.f32.vlgmr.msra.gmra.mrb[10].mxu0 %vm666_vm0, %v623_v37  ;;  %v6244_v37 = vld [vmem:[%s5817_s30 + $0x1e0] sm:$0xff]  ;;  %v6250_v23 = vmul.f32 %v561_v45, %v6228_v10  ;;  %v505_v45 = vrot.slane %v343_v29, %v5830_v12  ;;  %v213_v29 = vld [vmem:[%s5817_s30 + $0x118] sm:$0xff] }
  0x50   : > { %7017 = vst [vmem:[#allocation17_spill] sm:$0xff] %v6218_v5  ;;  %7018 = vst [vmem:[#allocation18_spill] sm:$0xff] %v6222_v28  ;;  %v441_v5 = vcombine.high %v437_v47, %v437_v47  ;;  %5498 = vmatpush3.bf16.xpose.msk.msra.mxu0 %vm5822_vm1, %v5955_v41  ;;  %5285 = vmatprep.mubr.msk.f32.mxu0 %vm666_vm0, %v626_v42  ;;  %v6247_v40 = vmul.f32 %v565_v9, %v6234_v16  ;;  %v210_v41 = vld [vmem:[%s5817_s30 + $0x100] sm:$0xff] }
  0x51   : > { %7020 = vst [vmem:[#allocation20_spill] sm:$0xff] %v6241_v8  ;;  %7022 = vst [vmem:[#allocation22_spill] sm:$0xff] %v6250_v23  ;;  %5279 = vmatmul.mubr.msk.f32.vlgmr.msra.gmra.mrb[10].mxu1 %vm666_vm0, %v625_v56  ;;  %5507 = vmatprep.subr.msk.bf16.mxu0 %vm5822_vm1, %v5505_v61  ;;  %v6258_v47 = vmul.f32 %v565_v9, %v6244_v37  ;;  %v211_v56 = vld [vmem:[%s5817_s30 + $0x108] sm:$0xff]  ;;  %v6270_v8 = vld [vmem:[%s5817_s30 + $0x1f8] sm:$0xff]  ;;  %v627_v23 = vmul.f32 %v6098_v60, %v5932_v30 }
  0x52   : > { %7021 = vst [vmem:[#allocation21_spill] sm:$0xff] %v6247_v40  ;;  %v569_v42 = vrot.slane %v441_v5, %v5830_v12  ;;  %5504 = vmatpush3.bf16.xpose.msk.msra.mxu1 %vm5822_vm1, %v6004_v63  ;;  %5292 = vmatprep.mubr.msk.f32.mxu1 %vm666_vm0, %v628_v6  ;;  %v6267_v40 = vld [vmem:[%s5817_s30 + $0x1f0] sm:$0xff]  ;;  %v630_v6 = vmul.f32 %v501_v48, %v206_v36 }
  0x53   : > { %7023 = vst [vmem:[#allocation23_spill] sm:$0xff] %v6258_v47  ;;  %5513 = vmatprep.subr.msk.bf16.mxu1 %vm5822_vm1, %v5511_v11  ;;  %v212_v9 = vld [vmem:[%s5817_s30 + $0x110] sm:$0xff]  ;;  %v629_v47 = vmul.f32 %v6145_v26, %v5977_v49  ;;  %v5517_v28 = vpack.c.bf16 %v211_v56, %v210_v41  ;;  %v632_v16 = vmul.f32 %v505_v45, %v208_v3  ;;  %s5669_s30 = scalar_lea.vmem %s5668_s29, 2048 }
  0x54   : > { %v6277_v5 = vmul.f32 %v569_v42, %v6270_v8  ;;  %v6280_v63 = vmul.f32 %v569_v42, %v6267_v40  ;;  %v5523_v30 = vpack.c.bf16 %v213_v29, %v212_v9  ;;  %v509_v60 = vrot.slane %v5944_v38, %v5830_v12  ;;  %p5671_p2 = scmp.lt.s32.totalorder %s5669_s30, %s5663_s27 }
  0x55   : > { %v513_v3 = vrot.slane %v5980_v50, %v5830_v12  ;;  %v631_v49 = vmul.f32 %v501_v48, %v6176_v59  ;;  %v633_v38 = vmul.f32 %v505_v45, %v209_v54  ;;  %v5529_v36 = vpack.c.bf16 %v5996_v58, %v5993_v57 }
  0x56   : > { %v634_v26 = vmul.f32 %v509_v60, %v210_v41  ;;  %v635_v12 = vmul.f32 %v509_v60, %v211_v56  ;;  %v5541_v57 = vpack.c.bf16 %v6030_v15, %v6042_v19  ;;  %v5547_v58 = vpack.c.bf16 %v6067_v32, %v6055_v21  ;;  %v7025_v19 = vld [vmem:[#allocation14_spill] sm:$0xff]  ;;  %p5672_p3 = por %p5671_p2, %p5670_p1 }
  0x57   : > { %5286 = vmatmul.mubr.msk.f32.vlgmr.msra.gmra.mrb[12].mxu0 %vm666_vm0, %v627_v23  ;;  %v637_v50 = vmul.f32 %v513_v3, %v213_v29  ;;  %v5577_v15 = vpack.c.bf16 %v6154_v53, %v6151_v52  ;;  %v7027_v21 = vld [vmem:[#allocation6_spill] sm:$0xff]  ;;  %v5589_v32 = vpack.c.bf16 %v6215_v31, %v6212_v39  ;;  %v5728_v54 = vmov 1983009808  }
  0x58   : > { %5510 = vmatpush3.bf16.xpose.msk.msra.mxu0 %vm5822_vm1, %v5505_v61  ;;  %5299 = vmatprep.mubr.msk.f32.mxu0 %vm666_vm0, %v630_v6  ;;  %v636_v61 = vmul.f32 %v513_v3, %v212_v9  ;;  %v3454_v59 = vunpack.c.l.s4 %v5728_v54  ;;  %p5673_p4 = pnand %p5672_p3, %p5666_p0 }
  0x59   : > { %5293 = vmatmul.mubr.msk.f32.vlgmr.msra.gmra.mrb[12].mxu1 %vm666_vm0, %v629_v47  ;;  %5519 = vmatprep.subr.msk.bf16.mxu0 %vm5822_vm1, %v5517_v28  ;;  %v7041_v52 = vld [vmem:[#allocation21_spill] sm:$0xff] }
  0x5a   : > { %5516 = vmatpush3.bf16.xpose.msk.msra.mxu1 %vm5822_vm1, %v5511_v11  ;;  %5306 = vmatprep.mubr.msk.f32.mxu1 %vm666_vm0, %v632_v16  ;;  %v5535_v11 = vpack.c.bf16 %v6027_v14, %v6024_v13  ;;  %v5553_v13 = vpack.c.bf16 %v6073_v35, %v6070_v34  ;;  %v5571_v14 = vpack.c.bf16 %v6132_v25, %v6129_v55  ;;  %v7029_v34 = vld [vmem:[#allocation7_spill] sm:$0xff]  ;;  %v7037_v55 = vld [vmem:[#allocation22_spill] sm:$0xff]  ;;  %v7038_v25 = vld [vmem:[#allocation17_spill] sm:$0xff]  ;;  %v3455_v48 = vunpack.c.0.s8 %v3454_v59 }
  0x5b   : > { %5525 = vmatprep.subr.msk.bf16.mxu1 %vm5822_vm1, %v5523_v30  ;;  %v5595_v35 = vpack.c.bf16 %v6231_v51, %v6228_v10  ;;  %v7039_v31 = vld [vmem:[#allocation23_spill] sm:$0xff]  ;;  %v7040_v51 = vld [vmem:[#allocation20_spill] sm:$0xff] }
  0x5f   : > { %5300 = vmatmul.mubr.msk.f32.vlgmr.msra.gmra.mrb[14].mxu0 %vm666_vm0, %v631_v49 }
  0x60   : > { %5522 = vmatpush3.bf16.xpose.msk.msra.mxu0 %vm5822_vm1, %v5517_v28  ;;  %5313 = vmatprep.mubr.msk.f32.mxu0 %vm666_vm0, %v634_v26 }
  0x61   : > { %5307 = vmatmul.mubr.msk.f32.vlgmr.msra.gmra.mrb[14].mxu1 %vm666_vm0, %v633_v38  ;;  %5531 = vmatprep.subr.msk.bf16.mxu0 %vm5822_vm1, %v5529_v36 }
  0x62   : > { %5528 = vmatpush3.bf16.xpose.msk.msra.mxu1 %vm5822_vm1, %v5523_v30  ;;  %5320 = vmatprep.mubr.msk.f32.mxu1 %vm666_vm0, %v636_v61 }
  0x63   : > { %5537 = vmatprep.subr.msk.bf16.mxu1 %vm5822_vm1, %v5535_v11 }
  0x67   : > { %5314 = vmatmul.mubr.msk.f32.vlgmr.msra.gmra.mrb[16].mxu0 %vm666_vm0, %v635_v12 }
  0x68   : > { %5534 = vmatpush3.bf16.xpose.msk.msra.mxu0 %vm5822_vm1, %v5529_v36  ;;  %5327 = vmatprep.mubr.msk.f32.mxu0 %vm666_vm0, %v6010_v1  ;;  %v5559_v1 = vpack.c.bf16 %v6106_v2, %v6103_v62  ;;  %v7034_v2 = vld [vmem:[#allocation11_spill] sm:$0xff] }
  0x69   : > { %5321 = vmatmul.mubr.msk.f32.vlgmr.msra.gmra.mrb[16].mxu1 %vm666_vm0, %v637_v50  ;;  %5543 = vmatprep.subr.msk.bf16.mxu0 %vm5822_vm1, %v5541_v57 }
  0x6a   : > { %5540 = vmatpush3.bf16.xpose.msk.msra.mxu1 %vm5822_vm1, %v5535_v11  ;;  %5334 = vmatprep.mubr.msk.f32.mxu1 %vm666_vm0, %v6048_v22  ;;  %v7026_v22 = vld [vmem:[#allocation8_spill] sm:$0xff] }
  0x6b   : > { %5549 = vmatprep.subr.msk.bf16.mxu1 %vm5822_vm1, %v5547_v58 }
  0x6f   : > { %5328 = vmatmul.mubr.msk.f32.vlgmr.msra.gmra.mrb[18].mxu0 %vm666_vm0, %v6007_v0  ;;  %v5565_v0 = vpack.c.bf16 %v6109_v4, %v6117_v17  ;;  %v5607_v4 = vpack.c.bf16 %v6270_v8, %v6267_v40  ;;  %v7035_v17 = vld [vmem:[#allocation18_spill] sm:$0xff]  ;;  %v7042_v8 = vld [vmem:[#allocation5_spill] sm:$0xff] }
  0x70   : > { %5546 = vmatpush3.bf16.xpose.msk.msra.mxu0 %vm5822_vm1, %v5541_v57  ;;  %5341 = vmatprep.mubr.msk.f32.mxu0 %vm666_vm0, %v6059_v27  ;;  %v7028_v27 = vld [vmem:[#allocation10_spill] sm:$0xff]  ;;  %v6454_v7 = vsub.s32 %v3455_v48, %v7042_v8 }
  0x71   : > { %5335 = vmatmul.mubr.msk.f32.vlgmr.msra.gmra.mrb[18].mxu1 %vm666_vm0, %v6039_v18  ;;  %5555 = vmatprep.subr.msk.bf16.mxu0 %vm5822_vm1, %v5553_v13  ;;  %v7024_v18 = vld [vmem:[#allocation13_spill] sm:$0xff] }
  0x72   : > { %5552 = vmatpush3.bf16.xpose.msk.msra.mxu1 %vm5822_vm1, %v5547_v58  ;;  %5348 = vmatprep.mubr.msk.f32.mxu1 %vm666_vm0, %v6086_v44  ;;  %v7032_v44 = vld [vmem:[#allocation16_spill] sm:$0xff] }
  0x73   : > { %5561 = vmatprep.subr.msk.bf16.mxu1 %vm5822_vm1, %v5559_v1 }
  0x77   : > { %5342 = vmatmul.mubr.msk.f32.vlgmr.msra.gmra.mrb[20].mxu0 %vm666_vm0, %v6045_v20  ;;  %v5583_v20 = vpack.c.bf16 %v7025_v19, %v7024_v18 }
  0x78   : > { %5558 = vmatpush3.bf16.xpose.msk.msra.mxu0 %vm5822_vm1, %v5553_v13  ;;  %5355 = vmatprep.mubr.msk.f32.mxu0 %vm666_vm0, %v6089_v46  ;;  %v7033_v46 = vld [vmem:[#allocation19_spill] sm:$0xff] }
  0x79   : > { %5349 = vmatmul.mubr.msk.f32.vlgmr.msra.gmra.mrb[20].mxu1 %vm666_vm0, %v6080_v33  ;;  %5567 = vmatprep.subr.msk.bf16.mxu0 %vm5822_vm1, %v5565_v0  ;;  %v7030_v33 = vld [vmem:[#allocation12_spill] sm:$0xff]  ;;  %v5601_v62 = vpack.c.bf16 %v7033_v46, %v6244_v37 }
  0x7a   : > { %5564 = vmatpush3.bf16.xpose.msk.msra.mxu1 %vm5822_vm1, %v5559_v1  ;;  %5362 = vmatprep.mubr.msk.f32.mxu1 %vm666_vm0, %v6123_v24  ;;  %v7036_v24 = vld [vmem:[#allocation15_spill] sm:$0xff] }
  0x7b   : > { %5573 = vmatprep.subr.msk.bf16.mxu1 %vm5822_vm1, %v5571_v14 }
  0x7f   : > { %5356 = vmatmul.mubr.msk.f32.vlgmr.msra.gmra.mrb[22].mxu0 %vm666_vm0, %v6083_v43  ;;  %v7031_v43 = vld [vmem:[#allocation9_spill] sm:$0xff] }
  0x80   : > { %5570 = vmatpush3.bf16.xpose.msk.msra.mxu0 %vm5822_vm1, %v5565_v0  ;;  %5369 = vmatprep.mubr.msk.f32.mxu0 %vm666_vm0, %v7026_v22 }
  0x81   : > { %5363 = vmatmul.mubr.msk.f32.vlgmr.msra.gmra.mrb[22].mxu1 %vm666_vm0, %v7027_v21  ;;  %5579 = vmatprep.subr.msk.bf16.mxu0 %vm5822_vm1, %v5577_v15 }
  0x82   : > { %5576 = vmatpush3.bf16.xpose.msk.msra.mxu1 %vm5822_vm1, %v5571_v14  ;;  %5376 = vmatprep.mubr.msk.f32.mxu1 %vm666_vm0, %v7028_v27 }
  0x83   : > { %5585 = vmatprep.subr.msk.bf16.mxu1 %vm5822_vm1, %v5583_v20 }
  0x87   : > { %5370 = vmatmul.mubr.msk.f32.vlgmr.msra.gmra.mrb[24].mxu0 %vm666_vm0, %v7029_v34 }
  0x88   : > { %5582 = vmatpush3.bf16.xpose.msk.msra.mxu0 %vm5822_vm1, %v5577_v15  ;;  %5383 = vmatprep.mubr.msk.f32.mxu0 %vm666_vm0, %v7030_v33 }
  0x89   : > { %5377 = vmatmul.mubr.msk.f32.vlgmr.msra.gmra.mrb[24].mxu1 %vm666_vm0, %v7031_v43  ;;  %5591 = vmatprep.subr.msk.bf16.mxu0 %vm5822_vm1, %v5589_v32 }
  0x8a   : > { %5588 = vmatpush3.bf16.xpose.msk.msra.mxu1 %vm5822_vm1, %v5583_v20  ;;  %5390 = vmatprep.mubr.msk.f32.mxu1 %vm666_vm0, %v7032_v44 }
  0x8b   : > { %5597 = vmatprep.subr.msk.bf16.mxu1 %vm5822_vm1, %v5595_v35 }
  0x8f   : > { %5384 = vmatmul.mubr.msk.f32.vlgmr.msra.gmra.mrb[26].mxu0 %vm666_vm0, %v7034_v2 }
  0x90   : > { %5594 = vmatpush3.bf16.xpose.msk.msra.mxu0 %vm5822_vm1, %v5589_v32  ;;  %5397 = vmatprep.mubr.msk.f32.mxu0 %vm666_vm0, %v7035_v17 }
  0x91   : > { %5391 = vmatmul.mubr.msk.f32.vlgmr.msra.gmra.mrb[26].mxu1 %vm666_vm0, %v7036_v24  ;;  %5603 = vmatprep.subr.msk.bf16.mxu0 %vm5822_vm1, %v5601_v62 }
  0x92   : > { %5600 = vmatpush3.bf16.xpose.msk.msra.mxu1 %vm5822_vm1, %v5595_v35  ;;  %5404 = vmatprep.mubr.msk.f32.mxu1 %vm666_vm0, %v7037_v55 }
  0x93   : > { %5609 = vmatprep.subr.msk.bf16.mxu1 %vm5822_vm1, %v5607_v4 }
  0x97   : > { %5398 = vmatmul.mubr.msk.f32.vlgmr.msra.gmra.mrb[28].mxu0 %vm666_vm0, %v7038_v25 }
  0x98   : > { %5606 = vmatpush3.bf16.xpose.msk.msra.mxu0 %vm5822_vm1, %v5601_v62  ;;  %5411 = vmatprep.mubr.msk.f32.mxu0 %vm666_vm0, %v7039_v31 }
  0x99   : > { %5405 = vmatmul.mubr.msk.f32.vlgmr.msra.gmra.mrb[28].mxu1 %vm666_vm0, %v7040_v51 }
  0x9a   : > { %5612 = vmatpush3.bf16.xpose.msk.msra.mxu1 %vm5822_vm1, %v5607_v4  ;;  %5418 = vmatprep.mubr.msk.f32.mxu1 %vm666_vm0, %v6280_v63  ;;  %v5729_v63 = vmov 1934713408  }
  0x9b   : > { %v3518_v6 = vunpack.c.l.s4 %v5729_v63 }
  0x9d   : > { %v3519_v15 = vunpack.c.0.s8 %v3518_v6 }
  0x9f   : > { %5412 = vmatmul.mubr.msk.f32.vlgmr.msra.gmra.mrb[30].mxu0 %vm666_vm0, %v7041_v52  ;;  %v6465_v22 = vsub.s32 %v3519_v15, %v7042_v8 }
  0xa1   : > { %5419 = vmatmul.mubr.msk.f32.vlgmr.msra.gmra.mrb[30].mxu1 %vm666_vm0, %v6277_v5 }
  0xfa   : > { %v5203_v53 = vpop.f32.mrb[0].mxu0 }
  0xfb   : > { %v745_v16 = vpop.f32.mrb[1].mxu0 }
  0xfc   : > { %v5210_v39 = vpop.f32.mrb[0].mxu1 }
  0xfd   : > { %v832_v28 = vpop.f32.mrb[1].mxu1 }
 0x102   : > { %v5217_v10 = vpop.f32.mrb[2].mxu0 }
 0x103   : > { %v3995_v37 = vcombine.low %v5203_v53, %v5217_v10  ;;  %v3996_v40 = vcombine.high %v5203_v53, %v5217_v10  ;;  %v919_v23 = vpop.f32.mrb[3].mxu0 }
 0x104   : > { %v3451_v41 = vcombine.low %v745_v16, %v919_v23  ;;  %v3452_v42 = vcombine.high %v745_v16, %v919_v23  ;;  %v5224_v47 = vpop.f32.mrb[2].mxu1 }
 0x105   : > { %v4011_v45 = vcombine.low %v5210_v39, %v5224_v47  ;;  %v4012_v56 = vcombine.high %v5210_v39, %v5224_v47  ;;  %v1006_v5 = vpop.f32.mrb[3].mxu1  ;;  %v4003_v30 = vrot.slane %v3995_v37, %v6454_v7  ;;  %v4010_v60 = vrot.slane %v3996_v40, %v6454_v7 }
 0x106   : > { %v3467_v9 = vcombine.low %v832_v28, %v1006_v5  ;;  %v3468_v29 = vcombine.high %v832_v28, %v1006_v5  ;;  %v3459_v26 = vrot.slane %v3451_v41, %v6454_v7  ;;  %v3466_v38 = vrot.slane %v3452_v42, %v6454_v7 }
 0x107   : > { %v4019_v3 = vrot.slane %v4011_v45, %v6454_v7  ;;  %v4026_v49 = vrot.slane %v4012_v56, %v6454_v7 }
 0x108   : > { %v3475_v36 = vrot.slane %v3467_v9, %v6454_v7  ;;  %v3482_v61 = vrot.slane %v3468_v29, %v6454_v7 }
 0x109   : > { %v4060_v11 = vcombine.high %v4003_v30, %v4019_v3  ;;  %v4075_v12 = vcombine.low %v4010_v60, %v4026_v49  ;;  %v4076_v50 = vcombine.high %v4010_v60, %v4026_v49  ;;  %v4059_v57 = vcombine.low %v4003_v30, %v4019_v3 }
 0x10a   : > { %v3515_v58 = vcombine.low %v3459_v26, %v3475_v36  ;;  %v3516_v13 = vcombine.high %v3459_v26, %v3475_v36  ;;  %v3531_v1 = vcombine.low %v3466_v38, %v3482_v61  ;;  %v3532_v0 = vcombine.high %v3466_v38, %v3482_v61  ;;  %v5231_v14 = vpop.f32.mrb[4].mxu0 }
 0x10b   : > { %v1093_v18 = vpop.f32.mrb[5].mxu0  ;;  %v6468_v35 = vrot.slane %v4076_v50, %v6465_v22  ;;  %v6471_v33 = vrot.slane %v4059_v57, %v6465_v22  ;;  %v6474_v62 = vrot.slane %v4060_v11, %v6465_v22  ;;  %v6477_v2 = vrot.slane %v4075_v12, %v6465_v22 }
 0x10c   : > { %v5238_v19 = vpop.f32.mrb[4].mxu1  ;;  %v6480_v55 = vrot.slane %v3515_v58, %v6465_v22  ;;  %v6483_v25 = vrot.slane %v3516_v13, %v6465_v22  ;;  %v6486_v52 = vrot.slane %v3531_v1, %v6465_v22  ;;  %v6489_v53 = vrot.slane %v3532_v0, %v6465_v22 }
 0x10d   : > { %v1180_v20 = vpop.f32.mrb[5].mxu1 }
 0x112   : > { %v5245_v21 = vpop.f32.mrb[6].mxu0 }
 0x113   : > { %v4027_v27 = vcombine.low %v5231_v14, %v5245_v21  ;;  %v4028_v32 = vcombine.high %v5231_v14, %v5245_v21  ;;  %v1267_v34 = vpop.f32.mrb[7].mxu0 }
 0x114   : > { %v3483_v43 = vcombine.low %v1093_v18, %v1267_v34  ;;  %v3484_v44 = vcombine.high %v1093_v18, %v1267_v34  ;;  %v5252_v46 = vpop.f32.mrb[6].mxu1 }
 0x115   : > { %v4043_v4 = vcombine.low %v5238_v19, %v5252_v46  ;;  %v4044_v17 = vcombine.high %v5238_v19, %v5252_v46  ;;  %v1354_v24 = vpop.f32.mrb[7].mxu1  ;;  %v4035_v54 = vrot.slane %v4027_v27, %v6454_v7  ;;  %v4042_v59 = vrot.slane %v4028_v32, %v6454_v7 }
 0x116   : > { %v3499_v31 = vcombine.low %v1180_v20, %v1354_v24  ;;  %v3500_v51 = vcombine.high %v1180_v20, %v1354_v24  ;;  %v3491_v28 = vrot.slane %v3483_v43, %v6454_v7  ;;  %v3498_v48 = vrot.slane %v3484_v44, %v6454_v7 }
 0x117   : > { %v4051_v16 = vrot.slane %v4043_v4, %v6454_v7  ;;  %v4058_v39 = vrot.slane %v4044_v17, %v6454_v7 }
 0x118   : > { %v3507_v10 = vrot.slane %v3499_v31, %v6454_v7  ;;  %v3514_v8 = vrot.slane %v3500_v51, %v6454_v7 }
 0x119   : > { %v4092_v37 = vcombine.high %v4035_v54, %v4051_v16  ;;  %v4107_v40 = vcombine.low %v4042_v59, %v4058_v39  ;;  %v4108_v23 = vcombine.high %v4042_v59, %v4058_v39  ;;  %v4091_v41 = vcombine.low %v4035_v54, %v4051_v16 }
 0x11a   : > { %v3547_v42 = vcombine.low %v3491_v28, %v3507_v10  ;;  %v3548_v47 = vcombine.high %v3491_v28, %v3507_v10  ;;  %v3563_v45 = vcombine.low %v3498_v48, %v3514_v8  ;;  %v3564_v56 = vcombine.high %v3498_v48, %v3514_v8  ;;  %v5259_v5 = vpop.f32.mrb[8].mxu0 }
 0x11b   : > { %v1441_v63 = vpop.f32.mrb[9].mxu0  ;;  %v4122_v6 = vrot.slane %v4108_v23, %v6465_v22  ;;  %v6501_v9 = vrot.slane %v4091_v41, %v6465_v22  ;;  %v4106_v29 = vrot.slane %v4092_v37, %v6465_v22  ;;  %v6505_v30 = vrot.slane %v4107_v40, %v6465_v22 }
 0x11c   : > { %v5266_v60 = vpop.f32.mrb[8].mxu1  ;;  %v6508_v3 = vrot.slane %v3547_v42, %v6465_v22  ;;  %v6511_v49 = vrot.slane %v3548_v47, %v6465_v22  ;;  %v6514_v26 = vrot.slane %v3563_v45, %v6465_v22  ;;  %v6517_v38 = vrot.slane %v3564_v56, %v6465_v22 }
 0x11d   : > { %v1528_v36 = vpop.f32.mrb[9].mxu1  ;;  %v4129_v61 = vcombine.low %v6468_v35, %v4122_v6  ;;  %v4124_v11 = vcombine.high %v6471_v33, %v6501_v9  ;;  %v4123_v12 = vcombine.low %v6471_v33, %v6501_v9  ;;  %v4130_v50 = vcombine.high %v6468_v35, %v4122_v6 }
 0x11e   : > { %v4125_v57 = vcombine.low %v6474_v62, %v4106_v29  ;;  %v4126_v58 = vcombine.high %v6474_v62, %v4106_v29  ;;  %v3580_v13 = vcombine.high %v6480_v55, %v6508_v3  ;;  %v4127_v1 = vcombine.low %v6477_v2, %v6505_v30 }
 0x11f   : > { %4735 = vrot.lane.b32.xlu0 %v4129_v61, %s5730_s3  ;;  %4655 = vrot.lane.b32.xlu1 %v4124_v11, %s5731_s4  ;;  %v3581_v0 = vcombine.low %v6483_v25, %v6511_v49  ;;  %v4128_v14 = vcombine.high %v6477_v2, %v6505_v30  ;;  %v3582_v15 = vcombine.high %v6483_v25, %v6511_v49 }
 0x120   : > { %v3583_v18 = vcombine.low %v6486_v52, %v6514_v26  ;;  %v3584_v19 = vcombine.high %v6486_v52, %v6514_v26  ;;  %v3585_v20 = vcombine.low %v6489_v53, %v6517_v38  ;;  %v3586_v21 = vcombine.high %v6489_v53, %v6517_v38 }
 0x121   : > { %v3579_v27 = vcombine.low %v6480_v55, %v6508_v3 }
 0x122   : > { %v5273_v32 = vpop.f32.mrb[10].mxu0 }
 0x123   : > { %v4131_v34 = vcombine.low %v5259_v5, %v5273_v32  ;;  %v4132_v35 = vcombine.high %v5259_v5, %v5273_v32  ;;  %v1615_v43 = vpop.f32.mrb[11].mxu0  ;;  %4751 = vrot.lane.b32.xlu0 %v4130_v50, %s5732_s5  ;;  %4671 = vrot.lane.b32.xlu1 %v4125_v57, %s5733_s6 }
 0x124   : > { %v3587_v44 = vcombine.low %v1441_v63, %v1615_v43  ;;  %v3588_v46 = vcombine.high %v1441_v63, %v1615_v43  ;;  %v5280_v62 = vpop.f32.mrb[10].mxu1 }
 0x125   : > { %v4147_v2 = vcombine.low %v5266_v60, %v5280_v62  ;;  %v4148_v4 = vcombine.high %v5266_v60, %v5280_v62  ;;  %v1702_v17 = vpop.f32.mrb[11].mxu1  ;;  %v4139_v24 = vrot.slane %v4131_v34, %v6454_v7  ;;  %v4146_v51 = vrot.slane %v4132_v35, %v6454_v7 }
 0x126   : > { %v3603_v25 = vcombine.low %v1528_v36, %v1702_v17  ;;  %v3604_v31 = vcombine.high %v1528_v36, %v1702_v17  ;;  %v3595_v16 = vrot.slane %v3587_v44, %v6454_v7  ;;  %v3602_v39 = vrot.slane %v3588_v46, %v6454_v7 }
 0x127   : > { %v4155_v54 = vrot.slane %v4147_v2, %v6454_v7  ;;  %v4162_v59 = vrot.slane %v4148_v4, %v6454_v7  ;;  %4687 = vrot.lane.b32.xlu1 %v4126_v58, %s5734_s7  ;;  %4543 = vrot.lane.b32.xlu0 %v3580_v13, %s5731_s4 }
 0x128   : > { %v3611_v28 = vrot.slane %v3603_v25, %v6454_v7  ;;  %v3618_v48 = vrot.slane %v3604_v31, %v6454_v7 }
 0x129   : > { %v4195_v10 = vcombine.low %v4139_v24, %v4155_v54  ;;  %v4196_v8 = vcombine.high %v4139_v24, %v4155_v54  ;;  %v4211_v37 = vcombine.low %v4146_v51, %v4162_v59  ;;  %v4212_v40 = vcombine.high %v4146_v51, %v4162_v59 }
 0x12a   : > { %v3651_v23 = vcombine.low %v3595_v16, %v3611_v28  ;;  %v3652_v41 = vcombine.high %v3595_v16, %v3611_v28  ;;  %v3667_v42 = vcombine.low %v3602_v39, %v3618_v48  ;;  %v3668_v47 = vcombine.high %v3602_v39, %v3618_v48  ;;  %v5287_v45 = vpop.f32.mrb[12].mxu0 }
 0x12b   : > { %4703 = vrot.lane.b32.xlu1 %v4127_v1, %s5735_s8  ;;  %4559 = vrot.lane.b32.xlu0 %v3581_v0, %s5733_s6  ;;  %v1789_v56 = vpop.f32.mrb[13].mxu0  ;;  %v6567_v49 = vrot.slane %v4212_v40, %v6465_v22  ;;  %v6570_v36 = vrot.slane %v4195_v10, %v6465_v22  ;;  %v6573_v57 = vrot.slane %v4196_v8, %v6465_v22 }
 0x12c   : > { %v5294_v5 = vpop.f32.mrb[12].mxu1  ;;  %v6576_v58 = vrot.slane %v3652_v41, %v6465_v22  ;;  %v6585_v34 = vrot.slane %v3668_v47, %v6465_v22  ;;  %v6588_v35 = vrot.slane %v3651_v23, %v6465_v22 }
 0x12d   : > { %v1876_v63 = vpop.f32.mrb[13].mxu1 }
 0x12f   : > { %4719 = vrot.lane.b32.xlu1 %v4128_v14, %s5736_s14  ;;  %4575 = vrot.lane.b32.xlu0 %v3582_v15, %s5734_s7  ;;  %v6579_v14 = vrot.slane %v4211_v37, %v6465_v22  ;;  %v6582_v15 = vrot.slane %v3667_v42, %v6465_v22 }
 0x132   : > { %v5301_v6 = vpop.f32.mrb[14].mxu0 }
 0x133   : > { %v4163_v29 = vcombine.low %v5287_v45, %v5301_v6  ;;  %v4164_v30 = vcombine.high %v5287_v45, %v5301_v6  ;;  %v1963_v60 = vpop.f32.mrb[15].mxu0  ;;  %4591 = vrot.lane.b32.xlu0 %v3583_v18, %s5735_s8 }
 0x134   : > { %v3619_v61 = vcombine.low %v1789_v56, %v1963_v60  ;;  %v3620_v11 = vcombine.high %v1789_v56, %v1963_v60  ;;  %v5308_v50 = vpop.f32.mrb[14].mxu1 }
 0x135   : > { %v4179_v13 = vcombine.low %v5294_v5, %v5308_v50  ;;  %v4180_v1 = vcombine.high %v5294_v5, %v5308_v50  ;;  %v2050_v0 = vpop.f32.mrb[15].mxu1  ;;  %v4171_v43 = vrot.slane %v4163_v29, %v6454_v7  ;;  %v4178_v44 = vrot.slane %v4164_v30, %v6454_v7 }
 0x136   : > { %v3635_v18 = vcombine.low %v1876_v63, %v2050_v0  ;;  %v3636_v32 = vcombine.high %v1876_v63, %v2050_v0  ;;  %v3627_v2 = vrot.slane %v3619_v61, %v6454_v7  ;;  %v3634_v4 = vrot.slane %v3620_v11, %v6454_v7 }
 0x137   : > { %v4187_v46 = vrot.slane %v4179_v13, %v6454_v7  ;;  %v4194_v62 = vrot.slane %v4180_v1, %v6454_v7  ;;  %4607 = vrot.lane.b32.xlu0 %v3584_v19, %s5736_s14 }
 0x138   : > { %v3643_v17 = vrot.slane %v3635_v18, %v6454_v7  ;;  %v3650_v24 = vrot.slane %v3636_v32, %v6454_v7 }
 0x139   : > { %v4227_v25 = vcombine.low %v4171_v43, %v4187_v46  ;;  %v4228_v31 = vcombine.high %v4171_v43, %v4187_v46  ;;  %v4243_v51 = vcombine.low %v4178_v44, %v4194_v62  ;;  %v4244_v54 = vcombine.high %v4178_v44, %v4194_v62 }
 0x13a   : > { %v3683_v59 = vcombine.low %v3627_v2, %v3643_v17  ;;  %v3684_v16 = vcombine.high %v3627_v2, %v3643_v17  ;;  %v3699_v39 = vcombine.low %v3634_v4, %v3650_v24  ;;  %v3700_v28 = vcombine.high %v3634_v4, %v3650_v24  ;;  %v5315_v48 = vpop.f32.mrb[16].mxu0 }
 0x13b   : > { %4623 = vrot.lane.b32.xlu0 %v3585_v20, %s5730_s3  ;;  %v2137_v52 = vpop.f32.mrb[17].mxu0  ;;  %v4258_v26 = vrot.slane %v4244_v54, %v6465_v22  ;;  %v6608_v19 = vrot.slane %v4227_v25, %v6465_v22  ;;  %v4242_v10 = vrot.slane %v4228_v31, %v6465_v22  ;;  %v6612_v8 = vrot.slane %v4243_v51, %v6465_v22 }
 0x13c   : > { %v5322_v37 = vpop.f32.mrb[16].mxu1  ;;  %v3698_v40 = vrot.slane %v3684_v16, %v6465_v22  ;;  %v6616_v23 = vrot.slane %v3699_v39, %v6465_v22  ;;  %v6619_v41 = vrot.slane %v3700_v28, %v6465_v22  ;;  %v6622_v20 = vrot.slane %v3683_v59, %v6465_v22 }
 0x13d   : > { %v2224_v42 = vpop.f32.mrb[17].mxu1  ;;  %v4265_v47 = vcombine.low %v6567_v49, %v4258_v26  ;;  %v4266_v45 = vcombine.high %v6567_v49, %v4258_v26  ;;  %v4260_v56 = vcombine.high %v6570_v36, %v6608_v19  ;;  %v4261_v5 = vcombine.low %v6573_v57, %v4242_v10 }
 0x13e   : > { %v3717_v63 = vcombine.low %v6576_v58, %v3698_v40  ;;  %v4262_v6 = vcombine.high %v6573_v57, %v4242_v10  ;;  %v3718_v29 = vcombine.high %v6576_v58, %v3698_v40  ;;  %v4263_v30 = vcombine.low %v6579_v14, %v6612_v8 }
 0x13f   : > { %4639 = vrot.lane.b32.xlu0 %v3586_v21, %s5732_s5  ;;  %4737 = vrot.lane.b32.xlu1 %v4265_v47, %s5730_s3  ;;  %v3719_v60 = vcombine.low %v6582_v15, %v6616_v23  ;;  %v4264_v49 = vcombine.high %v6579_v14, %v6612_v8  ;;  %v3720_v61 = vcombine.high %v6582_v15, %v6616_v23 }
 0x140   : > { %v3721_v11 = vcombine.low %v6585_v34, %v6619_v41  ;;  %v3716_v50 = vcombine.high %v6588_v35, %v6622_v20  ;;  %v3722_v53 = vcombine.high %v6585_v34, %v6619_v41  ;;  %v4259_v38 = vcombine.low %v6570_v36, %v6608_v19 }
 0x141   : > { %v3715_v21 = vcombine.low %v6588_v35, %v6622_v20 }
 0x142   : > { %v5329_v57 = vpop.f32.mrb[18].mxu0 }
 0x143   : > { %v4267_v58 = vcombine.low %v5315_v48, %v5329_v57  ;;  %v4268_v13 = vcombine.high %v5315_v48, %v5329_v57  ;;  %v2311_v1 = vpop.f32.mrb[19].mxu0  ;;  %4753 = vrot.lane.b32.xlu1 %v4266_v45, %s5732_s5  ;;  %4657 = vrot.lane.b32.xlu0 %v4260_v56, %s5731_s4 }
 0x144   : > { %v3723_v0 = vcombine.low %v2137_v52, %v2311_v1  ;;  %v3724_v14 = vcombine.high %v2137_v52, %v2311_v1  ;;  %v5336_v15 = vpop.f32.mrb[18].mxu1 }
 0x145   : > { %v4283_v18 = vcombine.low %v5322_v37, %v5336_v15  ;;  %v4284_v32 = vcombine.high %v5322_v37, %v5336_v15  ;;  %v2398_v43 = vpop.f32.mrb[19].mxu1  ;;  %v4275_v44 = vrot.slane %v4267_v58, %v6454_v7  ;;  %v4282_v2 = vrot.slane %v4268_v13, %v6454_v7 }
 0x146   : > { %v3739_v46 = vcombine.low %v2224_v42, %v2398_v43  ;;  %v3740_v62 = vcombine.high %v2224_v42, %v2398_v43  ;;  %v3731_v24 = vrot.slane %v3723_v0, %v6454_v7  ;;  %v3738_v25 = vrot.slane %v3724_v14, %v6454_v7 }
 0x147   : > { %v4291_v4 = vrot.slane %v4283_v18, %v6454_v7  ;;  %v4298_v17 = vrot.slane %v4284_v32, %v6454_v7  ;;  %4673 = vrot.lane.b32.xlu0 %v4261_v5, %s5733_s6  ;;  %4561 = vrot.lane.b32.xlu1 %v3717_v63, %s5733_s6 }
 0x148   : > { %v3747_v31 = vrot.slane %v3739_v46, %v6454_v7  ;;  %v3754_v51 = vrot.slane %v3740_v62, %v6454_v7 }
 0x149   : > { %v4331_v54 = vcombine.low %v4275_v44, %v4291_v4  ;;  %v4332_v59 = vcombine.high %v4275_v44, %v4291_v4  ;;  %v4347_v16 = vcombine.low %v4282_v2, %v4298_v17  ;;  %v4348_v39 = vcombine.high %v4282_v2, %v4298_v17 }
 0x14a   : > { %v3787_v28 = vcombine.low %v3731_v24, %v3747_v31  ;;  %v3788_v48 = vcombine.high %v3731_v24, %v3747_v31  ;;  %v3803_v52 = vcombine.low %v3738_v25, %v3754_v51  ;;  %v3804_v26 = vcombine.high %v3738_v25, %v3754_v51  ;;  %v5343_v10 = vpop.f32.mrb[20].mxu0 }
 0x14b   : > { %4689 = vrot.lane.b32.xlu0 %v4262_v6, %s5734_s7  ;;  %4577 = vrot.lane.b32.xlu1 %v3718_v29, %s5734_s7  ;;  %v2485_v8 = vpop.f32.mrb[21].mxu0  ;;  %v6672_v42 = vrot.slane %v4348_v39, %v6465_v22  ;;  %v6675_v47 = vrot.slane %v4331_v54, %v6465_v22  ;;  %v6680_v63 = vrot.slane %v4332_v59, %v6465_v22 }
 0x14c   : > { %v5350_v37 = vpop.f32.mrb[20].mxu1  ;;  %v6686_v57 = vrot.slane %v4347_v16, %v6465_v22  ;;  %v6689_v0 = vrot.slane %v3803_v52, %v6465_v22  ;;  %v6696_v18 = vrot.slane %v3787_v28, %v6465_v22 }
 0x14d   : > { %v2572_v40 = vpop.f32.mrb[21].mxu1 }
 0x14f   : > { %4705 = vrot.lane.b32.xlu0 %v4263_v30, %s5735_s8  ;;  %4593 = vrot.lane.b32.xlu1 %v3719_v60, %s5735_s8  ;;  %v6683_v60 = vrot.slane %v3788_v48, %v6465_v22 }
 0x152   : > { %v5357_v23 = vpop.f32.mrb[22].mxu0 }
 0x153   : > { %v4299_v45 = vcombine.low %v5343_v10, %v5357_v23  ;;  %v4300_v56 = vcombine.high %v5343_v10, %v5357_v23  ;;  %v2659_v5 = vpop.f32.mrb[23].mxu0  ;;  %4721 = vrot.lane.b32.xlu0 %v4264_v49, %s5736_s14  ;;  %4609 = vrot.lane.b32.xlu1 %v3720_v61, %s5736_s14  ;;  %v6692_v49 = vrot.slane %v3804_v26, %v6465_v22 }
 0x154   : > { %v3755_v6 = vcombine.low %v2485_v8, %v2659_v5  ;;  %v3756_v29 = vcombine.high %v2485_v8, %v2659_v5  ;;  %v5364_v30 = vpop.f32.mrb[22].mxu1 }
 0x155   : > { %v4315_v58 = vcombine.low %v5350_v37, %v5364_v30  ;;  %v4316_v13 = vcombine.high %v5350_v37, %v5364_v30  ;;  %v2746_v1 = vpop.f32.mrb[23].mxu1  ;;  %v4307_v61 = vrot.slane %v4299_v45, %v6454_v7  ;;  %v4314_v32 = vrot.slane %v4300_v56, %v6454_v7 }
 0x156   : > { %v3771_v14 = vcombine.low %v2572_v40, %v2746_v1  ;;  %v3772_v15 = vcombine.high %v2572_v40, %v2746_v1  ;;  %v3763_v46 = vrot.slane %v3755_v6, %v6454_v7  ;;  %v3770_v62 = vrot.slane %v3756_v29, %v6454_v7 }
 0x157   : > { %v4323_v43 = vrot.slane %v4315_v58, %v6454_v7  ;;  %v4330_v44 = vrot.slane %v4316_v13, %v6454_v7  ;;  %4625 = vrot.lane.b32.xlu1 %v3721_v11, %s5730_s3  ;;  %4545 = vrot.lane.b32.xlu0 %v3716_v50, %s5731_s4 }
 0x158   : > { %v3779_v2 = vrot.slane %v3771_v14, %v6454_v7  ;;  %v3786_v4 = vrot.slane %v3772_v15, %v6454_v7 }
 0x159   : > { %v4363_v17 = vcombine.low %v4307_v61, %v4323_v43  ;;  %v4364_v24 = vcombine.high %v4307_v61, %v4323_v43  ;;  %v4379_v25 = vcombine.low %v4314_v32, %v4330_v44  ;;  %v4380_v31 = vcombine.high %v4314_v32, %v4330_v44 }
 0x15a   : > { %v3819_v51 = vcombine.low %v3763_v46, %v3779_v2  ;;  %v3820_v54 = vcombine.high %v3763_v46, %v3779_v2  ;;  %v3835_v11 = vcombine.low %v3770_v62, %v3786_v4  ;;  %v3836_v59 = vcombine.high %v3770_v62, %v3786_v4  ;;  %v5371_v16 = vpop.f32.mrb[24].mxu0 }
 0x15b   : > { %4641 = vrot.lane.b32.xlu1 %v3722_v53, %s5732_s5  ;;  %v2833_v50 = vpop.f32.mrb[25].mxu0  ;;  %v6718_v39 = vrot.slane %v4380_v31, %v6465_v22  ;;  %v6721_v28 = vrot.slane %v4363_v17, %v6465_v22  ;;  %v4378_v48 = vrot.slane %v4364_v24, %v6465_v22  ;;  %v6725_v52 = vrot.slane %v4379_v25, %v6465_v22 }
 0x15c   : > { %v5378_v26 = vpop.f32.mrb[24].mxu1  ;;  %v3834_v10 = vrot.slane %v3820_v54, %v6465_v22  ;;  %v3843_v8 = vrot.slane %v3835_v11, %v6465_v22  ;;  %v6730_v34 = vrot.slane %v3836_v59, %v6465_v22  ;;  %v6733_v41 = vrot.slane %v3819_v51, %v6465_v22 }
 0x15d   : > { %v2920_v53 = vpop.f32.mrb[25].mxu1  ;;  %v4401_v37 = vcombine.low %v6672_v42, %v6718_v39  ;;  %v4396_v40 = vcombine.high %v6675_v47, %v6721_v28  ;;  %v4397_v23 = vcombine.low %v6680_v63, %v4378_v48  ;;  %v4398_v45 = vcombine.high %v6680_v63, %v4378_v48 }
 0x15e   : > { %v3853_v56 = vcombine.low %v6683_v60, %v3834_v10  ;;  %v3854_v5 = vcombine.high %v6683_v60, %v3834_v10  ;;  %v4399_v6 = vcombine.low %v6686_v57, %v6725_v52  ;;  %v3855_v29 = vcombine.low %v6689_v0, %v3843_v8 }
 0x15f   : > { %4739 = vrot.lane.b32.xlu0 %v4401_v37, %s5730_s3  ;;  %4659 = vrot.lane.b32.xlu1 %v4396_v40, %s5731_s4  ;;  %v4400_v30 = vcombine.high %v6686_v57, %v6725_v52  ;;  %v3856_v58 = vcombine.high %v6689_v0, %v3843_v8  ;;  %v3857_v63 = vcombine.low %v6692_v49, %v6730_v34 }
 0x160   : > { %v3852_v60 = vcombine.high %v6696_v18, %v6733_v41  ;;  %v3858_v13 = vcombine.high %v6692_v49, %v6730_v34  ;;  %v4402_v1 = vcombine.high %v6672_v42, %v6718_v39  ;;  %v4395_v61 = vcombine.low %v6675_v47, %v6721_v28 }
 0x161   : > { %v3851_v57 = vcombine.low %v6696_v18, %v6733_v41 }
 0x162   : > { %v5385_v14 = vpop.f32.mrb[26].mxu0 }
 0x163   : > { %v4403_v0 = vcombine.low %v5371_v16, %v5385_v14  ;;  %v4404_v15 = vcombine.high %v5371_v16, %v5385_v14  ;;  %v3007_v32 = vpop.f32.mrb[27].mxu0  ;;  %4675 = vrot.lane.b32.xlu1 %v4397_v23, %s5733_s6  ;;  %4563 = vrot.lane.b32.xlu0 %v3853_v56, %s5733_s6 }
 0x164   : > { %v3859_v43 = vcombine.low %v2833_v50, %v3007_v32  ;;  %v3860_v44 = vcombine.high %v2833_v50, %v3007_v32  ;;  %v5392_v46 = vpop.f32.mrb[26].mxu1 }
 0x165   : > { %v4419_v62 = vcombine.low %v5378_v26, %v5392_v46  ;;  %v4420_v2 = vcombine.high %v5378_v26, %v5392_v46  ;;  %v3094_v4 = vpop.f32.mrb[27].mxu1  ;;  %v4411_v17 = vrot.slane %v4403_v0, %v6454_v7  ;;  %v4418_v31 = vrot.slane %v4404_v15, %v6454_v7 }
 0x166   : > { %v3875_v24 = vcombine.low %v2920_v53, %v3094_v4  ;;  %v3876_v25 = vcombine.high %v2920_v53, %v3094_v4  ;;  %v3867_v11 = vrot.slane %v3859_v43, %v6454_v7  ;;  %v3874_v59 = vrot.slane %v3860_v44, %v6454_v7 }
 0x167   : > { %v4427_v51 = vrot.slane %v4419_v62, %v6454_v7  ;;  %v4434_v54 = vrot.slane %v4420_v2, %v6454_v7  ;;  %4691 = vrot.lane.b32.xlu1 %v4398_v45, %s5734_s7  ;;  %4579 = vrot.lane.b32.xlu0 %v3854_v5, %s5734_s7 }
 0x168   : > { %v3883_v16 = vrot.slane %v3875_v24, %v6454_v7  ;;  %v3890_v50 = vrot.slane %v3876_v25, %v6454_v7 }
 0x169   : > { %v4467_v48 = vcombine.low %v4411_v17, %v4427_v51  ;;  %v4468_v52 = vcombine.high %v4411_v17, %v4427_v51  ;;  %v4483_v26 = vcombine.low %v4418_v31, %v4434_v54  ;;  %v4484_v10 = vcombine.high %v4418_v31, %v4434_v54 }
 0x16a   : > { %v3923_v8 = vcombine.low %v3867_v11, %v3883_v16  ;;  %v3924_v53 = vcombine.high %v3867_v11, %v3883_v16  ;;  %v3939_v37 = vcombine.low %v3874_v59, %v3890_v50  ;;  %v3940_v40 = vcombine.high %v3874_v59, %v3890_v50  ;;  %v5399_v23 = vpop.f32.mrb[28].mxu0 }
 0x16b   : > { %4707 = vrot.lane.b32.xlu1 %v4399_v6, %s5735_s8  ;;  %4595 = vrot.lane.b32.xlu0 %v3855_v29, %s5735_s8  ;;  %v3181_v45 = vpop.f32.mrb[29].mxu0  ;;  %v6780_v0 = vrot.slane %v4484_v10, %v6465_v22  ;;  %v6785_v6 = vrot.slane %v4467_v48, %v6465_v22 }
 0x16c   : > { %v5406_v56 = vpop.f32.mrb[28].mxu1  ;;  %v3938_v17 = vrot.slane %v3924_v53, %v6465_v22  ;;  %v3947_v25 = vrot.slane %v3939_v37, %v6465_v22  ;;  %v3954_v31 = vrot.slane %v3940_v40, %v6465_v22 }
 0x16d   : > { %v3268_v5 = vpop.f32.mrb[29].mxu1 }
 0x16f   : > { %4723 = vrot.lane.b32.xlu1 %v4400_v30, %s5736_s14  ;;  %4611 = vrot.lane.b32.xlu0 %v3856_v58, %s5736_s14  ;;  %v4482_v30 = vrot.slane %v4468_v52, %v6465_v22  ;;  %v6789_v58 = vrot.slane %v3923_v8, %v6465_v22 }
 0x172   : > { %v5413_v14 = vpop.f32.mrb[30].mxu0 }
 0x173   : > { %v4435_v15 = vcombine.low %v5399_v23, %v5413_v14  ;;  %v4436_v32 = vcombine.high %v5399_v23, %v5413_v14  ;;  %v3355_v43 = vpop.f32.mrb[31].mxu0  ;;  %4627 = vrot.lane.b32.xlu0 %v3857_v63, %s5730_s3  ;;  %4547 = vrot.lane.b32.xlu1 %v3852_v60, %s5731_s4  ;;  %v4491_v63 = vrot.slane %v4483_v26, %v6465_v22 }
 0x174   : > { %v3891_v29 = vcombine.low %v3181_v45, %v3355_v43  ;;  %v3892_v44 = vcombine.high %v3181_v45, %v3355_v43  ;;  %v5420_v46 = vpop.f32.mrb[30].mxu1 }
 0x175   : > { %v4451_v62 = vcombine.low %v5406_v56, %v5420_v46  ;;  %v4452_v2 = vcombine.high %v5406_v56, %v5420_v46  ;;  %v3442_v4 = vpop.f32.mrb[31].mxu1  ;;  %v4443_v51 = vrot.slane %v4435_v15, %v6454_v7  ;;  %v4450_v54 = vrot.slane %v4436_v32, %v6454_v7 }
 0x176   : > { %v3907_v24 = vcombine.low %v3268_v5, %v3442_v4  ;;  %v3908_v60 = vcombine.high %v3268_v5, %v3442_v4  ;;  %v3899_v16 = vrot.slane %v3891_v29, %v6454_v7  ;;  %v3906_v50 = vrot.slane %v3892_v44, %v6454_v7 }
 0x177   : > { %v4459_v11 = vrot.slane %v4451_v62, %v6454_v7  ;;  %v4466_v59 = vrot.slane %v4452_v2, %v6454_v7  ;;  %4643 = vrot.lane.b32.xlu0 %v3858_v13, %s5732_s5 }
 0x178   : > { %v3915_v48 = vrot.slane %v3907_v24, %v6454_v7  ;;  %v3922_v52 = vrot.slane %v3908_v60, %v6454_v7 }
 0x179   : > { %v4499_v26 = vcombine.low %v4443_v51, %v4459_v11  ;;  %v4500_v10 = vcombine.high %v4443_v51, %v4459_v11  ;;  %v4515_v8 = vcombine.low %v4450_v54, %v4466_v59  ;;  %v4516_v53 = vcombine.high %v4450_v54, %v4466_v59 }
 0x17a   : > { %v3955_v37 = vcombine.low %v3899_v16, %v3915_v48  ;;  %v3956_v40 = vcombine.high %v3899_v16, %v3915_v48  ;;  %v3971_v23 = vcombine.low %v3906_v50, %v3922_v52  ;;  %v3972_v45 = vcombine.high %v3906_v50, %v3922_v52 }
 0x17b   : > { %v4530_v56 = vrot.slane %v4516_v53, %v6465_v22  ;;  %v6809_v49 = vrot.slane %v4499_v26, %v6465_v22  ;;  %v4514_v34 = vrot.slane %v4500_v10, %v6465_v22  ;;  %v4523_v13 = vrot.slane %v4515_v8, %v6465_v22 }
 0x17c   : > { %v6814_v5 = vrot.slane %v3955_v37, %v6465_v22  ;;  %v3970_v7 = vrot.slane %v3956_v40, %v6465_v22  ;;  %v3979_v14 = vrot.slane %v3971_v23, %v6465_v22  ;;  %v3986_v15 = vrot.slane %v3972_v45, %v6465_v22 }
 0x17d   : > { %v4537_v32 = vcombine.low %v6780_v0, %v4530_v56  ;;  %v4532_v43 = vcombine.high %v6785_v6, %v6809_v49  ;;  %v4533_v29 = vcombine.low %v4482_v30, %v4514_v34  ;;  %v4534_v44 = vcombine.high %v4482_v30, %v4514_v34 }
 0x17e   : > { %v3988_v46 = vcombine.high %v6789_v58, %v6814_v5  ;;  %v3989_v62 = vcombine.low %v3938_v17, %v3970_v7  ;;  %v4535_v2 = vcombine.low %v4491_v63, %v4523_v13  ;;  %v3990_v4 = vcombine.high %v3938_v17, %v3970_v7 }
 0x17f   : > { %4741 = vrot.lane.b32.xlu1 %v4537_v32, %s5730_s3  ;;  %4661 = vrot.lane.b32.xlu0 %v4532_v43, %s5731_s4  ;;  %v4536_v24 = vcombine.high %v4491_v63, %v4523_v13  ;;  %v3991_v60 = vcombine.low %v3947_v25, %v3979_v14  ;;  %v3992_v22 = vcombine.high %v3947_v25, %v3979_v14 }
 0x180   : > { %v3993_v51 = vcombine.low %v3954_v31, %v3986_v15  ;;  %v3994_v54 = vcombine.high %v3954_v31, %v3986_v15  ;;  %v4538_v11 = vcombine.high %v6780_v0, %v4530_v56  ;;  %v4531_v30 = vcombine.low %v6785_v6, %v6809_v49 }
 0x181   : > { %v3987_v59 = vcombine.low %v6789_v58, %v6814_v5 }
 0x183   : > { %4677 = vrot.lane.b32.xlu0 %v4533_v29, %s5733_s6  ;;  %4549 = vrot.lane.b32.xlu1 %v3988_v46, %s5731_s4 }
 0x187   : > { %4693 = vrot.lane.b32.xlu0 %v4534_v44, %s5734_s7  ;;  %4565 = vrot.lane.b32.xlu1 %v3989_v62, %s5733_s6 }
 0x18b   : > { %4709 = vrot.lane.b32.xlu0 %v4535_v2, %s5735_s8  ;;  %4581 = vrot.lane.b32.xlu1 %v3990_v4, %s5734_s7 }
 0x18f   : > { %4725 = vrot.lane.b32.xlu0 %v4536_v24, %s5736_s14  ;;  %4597 = vrot.lane.b32.xlu1 %v3991_v60, %s5735_s8 }
 0x191   : > { %v4736_v0 = vpop.permute.xlu0 %4735  ;;  %v4656_v17 = vpop.permute.xlu1 %4655 }
 0x192   : > { %v4797_v42 = vsel %vm666_vm0, %v4123_v12, %v4656_v17 }
 0x193   : > { %4755 = vrot.lane.b32.xlu0 %v4402_v1, %s5732_s5  ;;  %4613 = vrot.lane.b32.xlu1 %v3992_v22, %s5736_s14 }
 0x195   : > { %v4752_v63 = vpop.permute.xlu0 %4751  ;;  %v4672_v25 = vpop.permute.xlu1 %4671 }
 0x196   : > { %v4801_v39 = vsel %vm4767_vm2, %v4797_v42, %v4672_v25 }
 0x197   : > { %4629 = vrot.lane.b32.xlu1 %v3993_v51, %s5730_s3 }
 0x199   : > { %v4688_v31 = vpop.permute.xlu1 %4687  ;;  %v4544_v16 = vpop.permute.xlu0 %4543 }
 0x19a   : > { %v4805_v1 = vsel %vm4772_vm3, %v4801_v39, %v4688_v31  ;;  %v4763_v37 = vsel %vm666_vm0, %v3579_v27, %v4544_v16 }
 0x19b   : > { %4645 = vrot.lane.b32.xlu1 %v3994_v54, %s5732_s5 }
 0x19d   : > { %v4704_v50 = vpop.permute.xlu1 %4703  ;;  %v4560_v48 = vpop.permute.xlu0 %4559 }
 0x19e   : > { %v4809_v52 = vsel %vm4777_vm4, %v4805_v1, %v4704_v50  ;;  %v4768_v40 = vsel %vm4767_vm2, %v4763_v37, %v4560_v48 }
 0x19f   : > { %4757 = vrot.lane.b32.xlu1 %v4538_v11, %s5732_s5 }
 0x1a1   : > { %v4720_v26 = vpop.permute.xlu1 %4719  ;;  %v4576_v10 = vpop.permute.xlu0 %4575 }
 0x1a2   : > { %v4813_v33 = vsel %vm4782_vm5, %v4809_v52, %v4720_v26  ;;  %v4773_v45 = vsel %vm4772_vm3, %v4768_v40, %v4576_v10 }
 0x1a3   : > { %v4817_v9 = vsel %vm4787_vm6, %v4813_v33, %v4736_v0 }
 0x1a4   : > { %v4821_v12 = vsel %vm4792_vm7, %v4817_v9, %v4752_v63 }
 0x1a5   : > { %4826 = vst [vmem:[%s6860_s21 + $0x8] sm:$0xff] %v4821_v12  ;;  %v4592_v8 = vpop.permute.xlu0 %4591 }
 0x1a6   : > { %v4778_v56 = vsel %vm4777_vm4, %v4773_v45, %v4592_v8 }
 0x1a9   : > { %v4608_v53 = vpop.permute.xlu0 %4607 }
 0x1aa   : > { %v4783_v34 = vsel %vm4782_vm5, %v4778_v56, %v4608_v53 }
 0x1ad   : > { %v4624_v23 = vpop.permute.xlu0 %4623 }
 0x1ae   : > { %v4788_v13 = vsel %vm4787_vm6, %v4783_v34, %v4624_v23 }
 0x1b1   : > { %v4640_v7 = vpop.permute.xlu0 %4639  ;;  %v4738_v14 = vpop.permute.xlu1 %4737 }
 0x1b2   : > { %v4793_v15 = vsel %vm4792_vm7, %v4788_v13, %v4640_v7 }
 0x1b3   : > { %4825 = vst [vmem:[%s6860_s21] sm:$0xff] %v4793_v15 }
 0x1b5   : > { %v4754_v32 = vpop.permute.xlu1 %4753  ;;  %v4658_v55 = vpop.permute.xlu0 %4657 }
 0x1b6   : > { %v4798_v62 = vsel %vm666_vm0, %v4259_v38, %v4658_v55 }
 0x1b9   : > { %v4674_v3 = vpop.permute.xlu0 %4673  ;;  %v4562_v27 = vpop.permute.xlu1 %4561 }
 0x1ba   : > { %v4802_v2 = vsel %vm4767_vm2, %v4798_v62, %v4674_v3 }
 0x1bd   : > { %v4690_v43 = vpop.permute.xlu0 %4689  ;;  %v4578_v29 = vpop.permute.xlu1 %4577 }
 0x1be   : > { %v4806_v4 = vsel %vm4772_vm3, %v4802_v2, %v4690_v43 }
 0x1c1   : > { %v4706_v44 = vpop.permute.xlu0 %4705  ;;  %v4594_v46 = vpop.permute.xlu1 %4593 }
 0x1c2   : > { %v4810_v24 = vsel %vm4777_vm4, %v4806_v4, %v4706_v44 }
 0x1c5   : > { %v4722_v60 = vpop.permute.xlu0 %4721  ;;  %v4610_v22 = vpop.permute.xlu1 %4609 }
 0x1c6   : > { %v4814_v51 = vsel %vm4782_vm5, %v4810_v24, %v4722_v60 }
 0x1c7   : > { %v4818_v54 = vsel %vm4787_vm6, %v4814_v51, %v4738_v14 }
 0x1c8   : > { %v4822_v11 = vsel %vm4792_vm7, %v4818_v54, %v4754_v32 }
 0x1c9   : > { %4828 = vst [vmem:[%s6860_s21 + $0x18] sm:$0xff] %v4822_v11  ;;  %v4626_v0 = vpop.permute.xlu1 %4625  ;;  %v4546_v36 = vpop.permute.xlu0 %4545 }
 0x1ca   : > { %v4764_v19 = vsel %vm666_vm0, %v3715_v21, %v4546_v36 }
 0x1cb   : > { %v4769_v38 = vsel %vm4767_vm2, %v4764_v19, %v4562_v27 }
 0x1cc   : > { %v4774_v17 = vsel %vm4772_vm3, %v4769_v38, %v4578_v29 }
 0x1cd   : > { %v4642_v63 = vpop.permute.xlu1 %4641  ;;  %v4779_v25 = vsel %vm4777_vm4, %v4774_v17, %v4594_v46 }
 0x1ce   : > { %v4784_v31 = vsel %vm4782_vm5, %v4779_v25, %v4610_v22 }
 0x1cf   : > { %v4789_v16 = vsel %vm4787_vm6, %v4784_v31, %v4626_v0 }
 0x1d0   : > { %v4794_v50 = vsel %vm4792_vm7, %v4789_v16, %v4642_v63 }
 0x1d1   : > { %4827 = vst [vmem:[%s6860_s21 + $0x10] sm:$0xff] %v4794_v50  ;;  %v4740_v48 = vpop.permute.xlu0 %4739  ;;  %v4660_v42 = vpop.permute.xlu1 %4659 }
 0x1d2   : > { %v4799_v32 = vsel %vm666_vm0, %v4395_v61, %v4660_v42 }
 0x1d5   : > { %v4676_v39 = vpop.permute.xlu1 %4675  ;;  %v4564_v35 = vpop.permute.xlu0 %4563 }
 0x1d6   : > { %v4803_v55 = vsel %vm4767_vm2, %v4799_v32, %v4676_v39 }
 0x1d9   : > { %v4692_v20 = vpop.permute.xlu1 %4691  ;;  %v4580_v21 = vpop.permute.xlu0 %4579 }
 0x1da   : > { %v4807_v3 = vsel %vm4772_vm3, %v4803_v55, %v4692_v20 }
 0x1dd   : > { %v4708_v1 = vpop.permute.xlu1 %4707  ;;  %v4596_v52 = vpop.permute.xlu0 %4595 }
 0x1de   : > { %v4811_v27 = vsel %vm4777_vm4, %v4807_v3, %v4708_v1 }
 0x1e1   : > { %v4724_v26 = vpop.permute.xlu1 %4723  ;;  %v4612_v10 = vpop.permute.xlu0 %4611 }
 0x1e2   : > { %v4815_v44 = vsel %vm4782_vm5, %v4811_v27, %v4724_v26 }
 0x1e3   : > { %v4819_v46 = vsel %vm4787_vm6, %v4815_v44, %v4740_v48 }
 0x1e5   : > { %v4628_v33 = vpop.permute.xlu0 %4627  ;;  %v4548_v9 = vpop.permute.xlu1 %4547 }
 0x1e6   : > { %v4765_v12 = vsel %vm666_vm0, %v3851_v57, %v4548_v9 }
 0x1e7   : > { %v4770_v8 = vsel %vm4767_vm2, %v4765_v12, %v4564_v35 }
 0x1e8   : > { %v4775_v53 = vsel %vm4772_vm3, %v4770_v8, %v4580_v21 }
 0x1e9   : > { %v4780_v37 = vsel %vm4777_vm4, %v4775_v53, %v4596_v52  ;;  %v4644_v23 = vpop.permute.xlu0 %4643 }
 0x1ea   : > { %v4785_v40 = vsel %vm4782_vm5, %v4780_v37, %v4612_v10 }
 0x1eb   : > { %v4790_v45 = vsel %vm4787_vm6, %v4785_v40, %v4628_v33 }
 0x1ec   : > { %v4795_v56 = vsel %vm4792_vm7, %v4790_v45, %v4644_v23 }
 0x1ed   : > { %4829 = vst [vmem:[%s6860_s21 + $0x20] sm:$0xff] %v4795_v56 }
 0x1f1   : > { %v4742_v34 = vpop.permute.xlu1 %4741  ;;  %v4662_v13 = vpop.permute.xlu0 %4661 }
 0x1f2   : > { %v4800_v24 = vsel %vm666_vm0, %v4531_v30, %v4662_v13 }
 0x1f5   : > { %v4678_v7 = vpop.permute.xlu0 %4677  ;;  %v4550_v18 = vpop.permute.xlu1 %4549 }
 0x1f6   : > { %v4766_v47 = vsel %vm666_vm0, %v3987_v59, %v4550_v18  ;;  %v4804_v22 = vsel %vm4767_vm2, %v4800_v24, %v4678_v7 }
 0x1f9   : > { %v4694_v41 = vpop.permute.xlu0 %4693  ;;  %v4566_v57 = vpop.permute.xlu1 %4565 }
 0x1fa   : > { %v4771_v28 = vsel %vm4767_vm2, %v4766_v47, %v4566_v57  ;;  %v4808_v58 = vsel %vm4772_vm3, %v4804_v22, %v4694_v41 }
 0x1fd   : > { %v4710_v14 = vpop.permute.xlu0 %4709  ;;  %v4582_v15 = vpop.permute.xlu1 %4581 }
 0x1fe   : > { %v4776_v60 = vsel %vm4772_vm3, %v4771_v28, %v4582_v15  ;;  %v4812_v59 = vsel %vm4777_vm4, %v4808_v58, %v4710_v14 }
 0x201   : > { %v4726_v43 = vpop.permute.xlu0 %4725  ;;  %v4598_v29 = vpop.permute.xlu1 %4597 }
 0x202   : > { %v4781_v51 = vsel %vm4777_vm4, %v4776_v60, %v4598_v29  ;;  %v4816_v49 = vsel %vm4782_vm5, %v4812_v59, %v4726_v43 }
 0x203   : > { %v4820_v11 = vsel %vm4787_vm6, %v4816_v49, %v4742_v34 }
 0x205   : > { %v4756_v62 = vpop.permute.xlu0 %4755  ;;  %v4614_v2 = vpop.permute.xlu1 %4613 }
 0x206   : > { %v4823_v4 = vsel %vm4792_vm7, %v4819_v46, %v4756_v62  ;;  %v4786_v5 = vsel %vm4782_vm5, %v4781_v51, %v4614_v2 }
 0x207   : > { %4830 = vst [vmem:[%s6860_s21 + $0x28] sm:$0xff] %v4823_v4 }
 0x209   : > { %v4630_v61 = vpop.permute.xlu1 %4629 }
 0x20a   : > { %v4791_v54 = vsel %vm4787_vm6, %v4786_v5, %v4630_v61 }
 0x20d   : > { %v4646_v6 = vpop.permute.xlu1 %4645 }
 0x20e   : > { %v4796_v30 = vsel %vm4792_vm7, %v4791_v54, %v4646_v6 }
 0x20f   : > { %4831 = vst [vmem:[%s6860_s21 + $0x30] sm:$0xff] %v4796_v30 }
 0x211   : > { %v4758_v0 = vpop.permute.xlu1 %4757 }
 0x212   : > { %v4824_v36 = vsel %vm4792_vm7, %v4820_v11, %v4758_v0 }
 0x213   : > { %4832 = vst [vmem:[%s6860_s21 + $0x38] sm:$0xff] %v4824_v36 }
 0x214   : > { %5676 = shalt.err (!%p5673_p4)
}
 0x215   : > { %s5677_s3 = scalar_lea.hbm %s6942_s26, 1024  ;;  %s5681_s7 = scalar_lea.hbm %s6995_s2, 2048 }
 0x216   : > { %p5678_p7 = scmp.ne.s32.totalorder %s6942_s26, %s5677_s3  ;;  %p5682_p10 = scmp.lt.u32.totalorder %s6942_s26, %s6995_s2 }
 0x217   : > { %p5683_p11 = scmp.lt.u32.totalorder %s5681_s7, %s5677_s3  ;;  %p5685_p13 = scmp.lt.u32.totalorder %s5677_s3, %s6942_s26 }
 0x218   : > { %p5679_p8 = pnand %p5678_p7, %p5792_p5 }
 0x219   : > { %p5684_p12 = por %p5683_p11, %p5682_p10 }
 0x21a   : > { %p5680_p9 = pneg %p5679_p8 }
 0x21b   : > { %p5686_p0 = por %p5685_p13, %p5684_p12 }
 0x21d   : > { %p5687_p1 = pnand %p5686_p0, %p5680_p9 }
 0x21f   : > { %5690 = shalt.err (!%p5687_p1)
}
 0x220   : > { %s5738_s16 = smov 256  }
 0x221   : > { %5613 = dma.vmem_to_hbm [thread:$0]  (%p5792_p5), %s6945_s23, 1024, %s6942_s26, %s6951_s13, %s5738_s16, %s5738_s16, %s5731_s4  }
 0x222 PF: > { %p5619_p2 = scmp.ge.s32.totalorder %s5725_s12, 2  ;;  %s4863_s17 = sand.u32 1, %s5713_s9  }
 0x223   : > { %s4864_s21 = scalar_lea.sflag [#allocation3], %s4863_s17 }
 0x224   : > { %p5616_p3 = pnand %p5619_p2, %p5796_p6 }
 0x226   : > { %5708 = dma.done.wait (!%p5616_p3), %s4864_s21, 1024  }
 0x227   : > { %5710 = vsyncadd (!%p5616_p3), %s4864_s21, 4294966272  ;;  %p12_p4 = scmp.ge.s32.totalorder %s5779_s15, 4   ;;  %s7043_s9 = smov %s5717_s10 }
 0x228   : > { %s7044_s10 = smov %s5721_s11  ;;  %s7045_s11 = smov %s5790_s18 }
 0x229   : > { %s7046_s12 = smov %s5779_s15  ;;  %14 = sbr.rel (!%p12_p4) target bundleno = 3 (0x3), region = 66 }
 0x230   :  { %4869 = vsyncpa [#allocation3], 1 }
 0x231   :  { %4871 = vsyncpa [#allocation3 + $0x1], 1 }

</bundles_post_ra>
